<compile_context>
chip_gen: v7x
topology: tpu7x:2x2x1
jax: 0.10.0
libtpu: 0.0.40
codegen_flags: <defaults>
</compile_context>

<pallas_src>
import math

import jax
import jax.numpy as jnp
import numpy as np
from jax.experimental import pallas as pl
from jax.experimental.pallas import tpu as pltpu

NUM_FLOWS = 4
D = 4             # feature dim (even -> pad_to_even is a no-op)
DH = D // 2
HIDDEN = 32
BATCH = 128
NEG_SLOPE = 0.01  # PyTorch LeakyReLU default


def _round_up(n, m):
    return ((n + m - 1) // m) * m


def _pack_layout(dh, hidden):
    """Row offsets of each section inside the packed (ROWS, 2*hidden) slab.

    Sections (all pre-transposed for batch-on-lanes, i.e. layer = W^T @ act):
      r_w2t : (2H, 2H)  block-diagonal W2^T
      r_w1b : (2H, *)   cols [0:dh] = W1^T, col dh = b1, col dh+1 = b2,
                        col dh+2 (rows 0:2dh) = b3
      r_w3t : (2dh, 2H) W3^T
    """
    two_h = 2 * hidden
    r_w2t = 0
    r_w1b = _round_up(r_w2t + two_h, 16)
    r_w3t = _round_up(r_w1b + two_h, 16)
    total = _round_up(r_w3t + 2 * dh, 16)     # 16-row align (bf16 packing)
    return r_w2t, r_w1b, r_w3t, total


def _block_diag(a, b):
    ha, wa = a.shape
    hb, wb = b.shape
    top = jnp.concatenate([a, jnp.zeros((ha, wb), a.dtype)], axis=1)
    bot = jnp.concatenate([jnp.zeros((hb, wa), b.dtype), b], axis=1)
    return jnp.concatenate([top, bot], axis=0)


def pack_params(params, matmul_dtype=jnp.bfloat16):
    """Fuse the s/t nets, fold the flip permutation into odd flows' weights,
    transpose for the batch-on-lanes layout and pack everything into a single
    (F, ROWS, 2*HIDDEN) buffer in `matmul_dtype`."""
    (s_w1, s_b1, s_w2, s_b2, s_w3, s_b3,
     t_w1, t_b1, t_w2, t_b2, t_w3, t_b3) = params
    num_flows, dh, hidden = s_w1.shape
    two_h = 2 * hidden
    assert two_h >= dh + 3, "bias columns must fit inside the slab lane width"
    r_w2t, r_w1b, r_w3t, total = _pack_layout(dh, hidden)

    slabs = []
    for i in range(num_flows):
        w1_s, w1_t = s_w1[i], t_w1[i]
        w3_s, w3_t = s_w3[i], t_w3[i]
        b3_s, b3_t = s_b3[i, 0], t_b3[i, 0]
        if i % 2 == 1:
            # Both coupling halves reach odd flows in reversed feature order;
            # absorb the reversal into the conditioner input rows (w1) and its
            # output columns (w3, b3).  The prior is permutation-invariant, so
            # no permutation remains in the kernel.
            w1_s, w1_t = jnp.flip(w1_s, 0), jnp.flip(w1_t, 0)
            w3_s, w3_t = jnp.flip(w3_s, 1), jnp.flip(w3_t, 1)
            b3_s, b3_t = jnp.flip(b3_s, 0), jnp.flip(b3_t, 0)

        w1f = jnp.concatenate([w1_s, w1_t], axis=1)              # (dh, 2H)
        w2f = _block_diag(s_w2[i], t_w2[i])                      # (2H, 2H)
        w3f = _block_diag(w3_s, w3_t)                            # (2H, 2dh)
        b1f = jnp.concatenate([s_b1[i, 0], t_b1[i, 0]])          # (2H,)
        b2f = jnp.concatenate([s_b2[i, 0], t_b2[i, 0]])          # (2H,)
        b3f = jnp.concatenate([b3_s, b3_t])                      # (2dh,)

        slab = jnp.zeros((total, two_h), jnp.float32)
        slab = slab.at[r_w2t:r_w2t + two_h, :].set(w2f.T)
        slab = slab.at[r_w1b:r_w1b + two_h, 0:dh].set(w1f.T)
        slab = slab.at[r_w1b:r_w1b + two_h, dh].set(b1f)
        slab = slab.at[r_w1b:r_w1b + two_h, dh + 1].set(b2f)
        slab = slab.at[r_w1b:r_w1b + 2 * dh, dh + 2].set(b3f)
        slab = slab.at[r_w3t:r_w3t + 2 * dh, :].set(w3f.T)
        slabs.append(slab)

    packed = jnp.stack(slabs, axis=0).astype(matmul_dtype)       # (F, ROWS, 2H)
    return packed, (r_w2t, r_w1b, r_w3t), (num_flows, dh, hidden)


def _make_kernel(num_flows, dh, hidden, layout, matmul_dtype):
    two_h = 2 * hidden
    r_w2t, r_w1b, r_w3t = layout
    log_p_const = -0.5 * math.log(2.0 * math.pi) * float(2 * dh)
    mm = matmul_dtype

    def kernel(x_ref, w_ref, out_ref):
        x = x_ref[...]                                # (D, TB) f32, lane-dense
        tb = x.shape[1]
        a = x[0:dh, :]                                # (dh, TB)
        b = x[dh:2 * dh, :]                           # (dh, TB)
        log_det = jnp.zeros((1, tb), jnp.float32)

        for i in range(num_flows):                    # static unroll (4 flows)
            w2t = w_ref[i, r_w2t:r_w2t + two_h, :]            # (2H, 2H)
            w1t = w_ref[i, r_w1b:r_w1b + two_h, 0:dh]         # (2H, dh)
            b1 = w_ref[i, r_w1b:r_w1b + two_h, dh:dh + 1].astype(jnp.float32)
            b2 = w_ref[i, r_w1b:r_w1b + two_h, dh + 1:dh + 2].astype(jnp.float32)
            b3 = w_ref[i, r_w1b:r_w1b + 2 * dh, dh + 2:dh + 3].astype(jnp.float32)
            w3t = w_ref[i, r_w3t:r_w3t + 2 * dh, :]           # (2dh, 2H)

            # bf16 (or f32) inputs to the MXU, f32 accumulation & elementwise.
            h = jnp.dot(w1t, a.astype(mm),
                        preferred_element_type=jnp.float32) + b1      # (2H, TB)
            h = jnp.maximum(h, NEG_SLOPE * h)                          # LeakyReLU
            h = jnp.dot(w2t, h.astype(mm),
                        preferred_element_type=jnp.float32) + b2
            h = jnp.maximum(h, NEG_SLOPE * h)
            o = jnp.dot(w3t, h.astype(mm),
                        preferred_element_type=jnp.float32) + b3       # (2dh, TB)
            s = jnp.tanh(o[0:dh, :])                  # s-net has final Tanh
            t = o[dh:2 * dh, :]                       # t-net is linear output
            yb = (b - t) * jnp.exp(-s)                # forward coupling
            a, b = yb, a                              # flip folded into weights
            log_det = log_det - jnp.sum(s, axis=0, keepdims=True)

        log_p = (-0.5 * (jnp.sum(a * a, axis=0, keepdims=True)
                         + jnp.sum(b * b, axis=0, keepdims=True))
                 + log_p_const)
        out_ref[...] = -(log_p + log_det)             # (1, TB) lane-dense NLL

    return kernel


def _choose_tile(bsz):
    b = _round_up(bsz, 128)
    if b <= 512:
        return b            # small batches: single (or few) grid steps
    return 512              # large batches: 512-row lane tiles, >=4 grid steps


def realnvp_forward(x, params, tile_b=None, matmul_dtype=jnp.bfloat16):
    """RealNVP.forward(x, reduction='avg') -> scalar mean NLL."""
    x = jnp.asarray(x, jnp.float32)
    if x.shape[1] % 2 != 0:                           # pad_to_even (glue)
        x = jnp.pad(x, ((0, 0), (0, 1)))
    bsz, d = x.shape
    dh = d // 2

    packed, layout, (num_flows, p_dh, hidden) = pack_params(params, matmul_dtype)
    assert p_dh == dh, "parameter feature dim does not match padded input"

    if tile_b is None:
        tile_b = _choose_tile(bsz)
    tile_b = _round_up(tile_b, 128)
    b_pad = _round_up(bsz, tile_b)
    xt = x.T                                          # (D, B): batch on lanes
    if b_pad != bsz:
        xt = jnp.pad(xt, ((0, 0), (0, b_pad - bsz)))
    grid = (b_pad // tile_b,)

    kernel = _make_kernel(num_flows, dh, hidden, layout, matmul_dtype)
    nll = pl.pallas_call(
        kernel,
        out_shape=jax.ShapeDtypeStruct((1, b_pad), jnp.float32),
        grid=grid,
        in_specs=[
            pl.BlockSpec((d, tile_b), lambda g: (0, g)),
            pl.BlockSpec(packed.shape, lambda g: (0, 0, 0)),   # resident weights
        ],
        out_specs=pl.BlockSpec((1, tile_b), lambda g: (0, g)),
        compiler_params=pltpu.CompilerParams(
            dimension_semantics=("parallel",)),
    )(xt, packed)
    return jnp.sum(nll[0, :bsz]) / bsz


def init_params(key, num_flows=NUM_FLOWS, dh=DH, hidden=HIDDEN):
    ks = jax.random.split(key, 12)

    def w(k, shape, fan_in):
        return (jax.random.normal(k, shape) / jnp.sqrt(fan_in)).astype(jnp.float32)

    def bias(k, shape):
        return (0.01 * jax.random.normal(k, shape)).astype(jnp.float32)

    s_w1 = w(ks[0], (num_flows, dh, hidden), dh)
    s_b1 = bias(ks[1], (num_flows, 1, hidden))
    s_w2 = w(ks[2], (num_flows, hidden, hidden), hidden)
    s_b2 = bias(ks[3], (num_flows, 1, hidden))
    s_w3 = w(ks[4], (num_flows, hidden, dh), hidden)
    s_b3 = bias(ks[5], (num_flows, 1, dh))
    t_w1 = w(ks[6], (num_flows, dh, hidden), dh)
    t_b1 = bias(ks[7], (num_flows, 1, hidden))
    t_w2 = w(ks[8], (num_flows, hidden, hidden), hidden)
    t_b2 = bias(ks[9], (num_flows, 1, hidden))
    t_w3 = w(ks[10], (num_flows, hidden, dh), hidden)
    t_b3 = bias(ks[11], (num_flows, 1, dh))
    return (s_w1, s_b1, s_w2, s_b2, s_w3, s_b3,
            t_w1, t_b1, t_w2, t_b2, t_w3, t_b3)


def ref_forward(x, params, num_flows=NUM_FLOWS):
    """Pure-JAX replica of the PyTorch module's forward (reduction='avg')."""
    (s_w1, s_b1, s_w2, s_b2, s_w3, s_b3,
     t_w1, t_b1, t_w2, t_b2, t_w3, t_b3) = params
    if x.shape[1] % 2 != 0:
        x = jnp.pad(x, ((0, 0), (0, 1)))
    z = x
    dh = x.shape[1] // 2
    log_det = jnp.zeros((x.shape[0],), jnp.float32)

    def mlp(h, w1, b1, w2, b2, w3, b3, tanh):
        h = h @ w1 + b1[0]
        h = jnp.where(h > 0, h, NEG_SLOPE * h)
        h = h @ w2 + b2[0]
        h = jnp.where(h > 0, h, NEG_SLOPE * h)
        o = h @ w3 + b3[0]
        return jnp.tanh(o) if tanh else o

    for i in range(num_flows):
        xa, xb = z[:, :dh], z[:, dh:]
        s = mlp(xa, s_w1[i], s_b1[i], s_w2[i], s_b2[i], s_w3[i], s_b3[i], True)
        t = mlp(xa, t_w1[i], t_b1[i], t_w2[i], t_b2[i], t_w3[i], t_b3[i], False)
        yb = (xb - t) * jnp.exp(-s)
        z = jnp.concatenate([xa, yb], axis=1)
        z = jnp.flip(z, axis=1)
        log_det = log_det - jnp.sum(s, axis=1)
    log_p = jnp.sum(-0.5 * z * z - 0.5 * jnp.log(2.0 * jnp.pi), axis=1)
    return -jnp.mean(log_p + log_det)


if __name__ == "__main__":
    key = jax.random.PRNGKey(0)
    kx, kp = jax.random.split(key)
    x = jax.random.normal(kx, (BATCH, D), dtype=jnp.float32)
    params = init_params(kp)

    nll_ref = jax.block_until_ready(ref_forward(x, params))

    # f32 matmul path: tight numerical check of the kernel structure.
    nll_f32 = jax.block_until_ready(
        realnvp_forward(x, params, matmul_dtype=jnp.float32))
    np.testing.assert_allclose(np.asarray(nll_f32), np.asarray(nll_ref),
                               rtol=1e-5, atol=1e-4)

    # bf16-input MXU path (default; recommended for v5e/v6e/v7x): looser check.
    nll_bf16 = jax.block_until_ready(
        realnvp_forward(x, params, matmul_dtype=jnp.bfloat16))
    np.testing.assert_allclose(np.asarray(nll_bf16), np.asarray(nll_ref),
                               rtol=5e-2, atol=5e-2)

    print("KERNEL_OK")
</pallas_src>

<mosaic_0001>
module attributes {stable_mosaic.version = 11 : i64} {
  func.func @kernel(%arg0: i32, %arg1: memref<4x128xf32, #tpu.memory_space<vmem>>, %arg2: memref<4x144x64xf32, #tpu.memory_space<vmem>>, %arg3: memref<1x128xf32, #tpu.memory_space<vmem>>) attributes {dimension_semantics = [#tpu.dimension_semantics<parallel>], iteration_bounds = array<i64: 1>, scalar_prefetch = 0 : i64, scratch_operands = 0 : i64, tpu.core_type = #tpu.core_type<tc>, window_params = [{transform_indices = @transform_0, window_bounds = array<i64: 4, 128>}, {pipeline_mode = #tpu.pipeline_mode<synchronous>, transform_indices = @transform_1, window_bounds = array<i64: 4, 144, 64>}, {transform_indices = @transform_2, window_bounds = array<i64: 1, 128>}]} {
    %c0 = arith.constant 0 : index
    %c0_0 = arith.constant 0 : index
    %0 = vector.load %arg1[%c0, %c0_0] : memref<4x128xf32, #tpu.memory_space<vmem>>, vector<4x128xf32>
    %1 = vector.extract_strided_slice %0 {offsets = [0, 0], sizes = [2, 128], strides = [1, 1]} : vector<4x128xf32> to vector<2x128xf32>
    %2 = vector.extract_strided_slice %0 {offsets = [2, 0], sizes = [2, 128], strides = [1, 1]} : vector<4x128xf32> to vector<2x128xf32>
    %cst = arith.constant 0.000000e+00 : f32
    %3 = vector.broadcast %cst : f32 to vector<1x128xf32>
    %c0_1 = arith.constant 0 : index
    %c0_2 = arith.constant 0 : index
    %c0_3 = arith.constant 0 : index
    %4 = vector.load %arg2[%c0_1, %c0_2, %c0_3] : memref<4x144x64xf32, #tpu.memory_space<vmem>>, vector<1x64x64xf32>
    %5 = vector.shape_cast %4 : vector<1x64x64xf32> to vector<64x64xf32>
    %c0_4 = arith.constant 0 : index
    %c64 = arith.constant 64 : index
    %c0_5 = arith.constant 0 : index
    %6 = vector.load %arg2[%c0_4, %c64, %c0_5] : memref<4x144x64xf32, #tpu.memory_space<vmem>>, vector<1x64x2xf32>
    %7 = vector.shape_cast %6 : vector<1x64x2xf32> to vector<64x2xf32>
    %c0_6 = arith.constant 0 : index
    %c64_7 = arith.constant 64 : index
    %c2 = arith.constant 2 : index
    %8 = vector.load %arg2[%c0_6, %c64_7, %c2] : memref<4x144x64xf32, #tpu.memory_space<vmem>>, vector<1x64x1xf32>
    %9 = vector.shape_cast %8 : vector<1x64x1xf32> to vector<64x1xf32>
    %c0_8 = arith.constant 0 : index
    %c64_9 = arith.constant 64 : index
    %c3 = arith.constant 3 : index
    %10 = vector.load %arg2[%c0_8, %c64_9, %c3] : memref<4x144x64xf32, #tpu.memory_space<vmem>>, vector<1x64x1xf32>
    %11 = vector.shape_cast %10 : vector<1x64x1xf32> to vector<64x1xf32>
    %c0_10 = arith.constant 0 : index
    %c64_11 = arith.constant 64 : index
    %c4 = arith.constant 4 : index
    %12 = vector.load %arg2[%c0_10, %c64_11, %c4] : memref<4x144x64xf32, #tpu.memory_space<vmem>>, vector<1x4x1xf32>
    %13 = vector.shape_cast %12 : vector<1x4x1xf32> to vector<4x1xf32>
    %c0_12 = arith.constant 0 : index
    %c128 = arith.constant 128 : index
    %c0_13 = arith.constant 0 : index
    %14 = vector.load %arg2[%c0_12, %c128, %c0_13] : memref<4x144x64xf32, #tpu.memory_space<vmem>>, vector<1x4x64xf32>
    %15 = vector.shape_cast %14 : vector<1x4x64xf32> to vector<4x64xf32>
    %cst_14 = arith.constant dense<0.000000e+00> : vector<64x128xf32>
    %16 = tpu.matmul %7, %1, %cst_14 {dimension_numbers = #tpu.dot_dimension_numbers<[1], [0], [0], [1], [0, 0, 1, 1], [], []>} : vector<64x2xf32>, vector<2x128xf32>, vector<64x128xf32> -> vector<64x128xf32>
    %17 = vector.broadcast %9 : vector<64x1xf32> to vector<64x128xf32>
    %18 = arith.addf %16, %17 : vector<64x128xf32>
    %cst_15 = arith.constant 0.00999999977 : f32
    %19 = vector.broadcast %cst_15 : f32 to vector<64x128xf32>
    %20 = arith.mulf %19, %18 : vector<64x128xf32>
    %21 = arith.maximumf %18, %20 : vector<64x128xf32>
    %cst_16 = arith.constant dense<0.000000e+00> : vector<64x128xf32>
    %22 = tpu.matmul %5, %21, %cst_16 {dimension_numbers = #tpu.dot_dimension_numbers<[1], [0], [0], [1], [0, 0, 1, 1], [], []>} : vector<64x64xf32>, vector<64x128xf32>, vector<64x128xf32> -> vector<64x128xf32>
    %23 = vector.broadcast %11 : vector<64x1xf32> to vector<64x128xf32>
    %24 = arith.addf %22, %23 : vector<64x128xf32>
    %cst_17 = arith.constant 0.00999999977 : f32
    %25 = vector.broadcast %cst_17 : f32 to vector<64x128xf32>
    %26 = arith.mulf %25, %24 : vector<64x128xf32>
    %27 = arith.maximumf %24, %26 : vector<64x128xf32>
    %cst_18 = arith.constant dense<0.000000e+00> : vector<4x128xf32>
    %28 = tpu.matmul %15, %27, %cst_18 {dimension_numbers = #tpu.dot_dimension_numbers<[1], [0], [0], [1], [0, 0, 1, 1], [], []>} : vector<4x64xf32>, vector<64x128xf32>, vector<4x128xf32> -> vector<4x128xf32>
    %29 = vector.broadcast %13 : vector<4x1xf32> to vector<4x128xf32>
    %30 = arith.addf %28, %29 : vector<4x128xf32>
    %31 = vector.extract_strided_slice %30 {offsets = [0, 0], sizes = [2, 128], strides = [1, 1]} : vector<4x128xf32> to vector<2x128xf32>
    %32 = math.tanh %31 : vector<2x128xf32>
    %33 = vector.extract_strided_slice %30 {offsets = [2, 0], sizes = [2, 128], strides = [1, 1]} : vector<4x128xf32> to vector<2x128xf32>
    %34 = arith.subf %2, %33 : vector<2x128xf32>
    %cst_19 = arith.constant 0.000000e+00 : f32
    %35 = vector.broadcast %cst_19 : f32 to vector<2x128xf32>
    %36 = arith.subf %35, %32 : vector<2x128xf32>
    %37 = math.exp %36 : vector<2x128xf32>
    %38 = arith.mulf %34, %37 : vector<2x128xf32>
    %cst_20 = arith.constant dense<0.000000e+00> : vector<128xf32>
    %39 = vector.multi_reduction <add>, %32, %cst_20 [0] : vector<2x128xf32> to vector<128xf32>
    %40 = vector.shape_cast %39 : vector<128xf32> to vector<1x128xf32>
    %41 = arith.subf %3, %40 : vector<1x128xf32>
    %c1 = arith.constant 1 : index
    %c0_21 = arith.constant 0 : index
    %c0_22 = arith.constant 0 : index
    %42 = vector.load %arg2[%c1, %c0_21, %c0_22] : memref<4x144x64xf32, #tpu.memory_space<vmem>>, vector<1x64x64xf32>
    %43 = vector.shape_cast %42 : vector<1x64x64xf32> to vector<64x64xf32>
    %c1_23 = arith.constant 1 : index
    %c64_24 = arith.constant 64 : index
    %c0_25 = arith.constant 0 : index
    %44 = vector.load %arg2[%c1_23, %c64_24, %c0_25] : memref<4x144x64xf32, #tpu.memory_space<vmem>>, vector<1x64x2xf32>
    %45 = vector.shape_cast %44 : vector<1x64x2xf32> to vector<64x2xf32>
    %c1_26 = arith.constant 1 : index
    %c64_27 = arith.constant 64 : index
    %c2_28 = arith.constant 2 : index
    %46 = vector.load %arg2[%c1_26, %c64_27, %c2_28] : memref<4x144x64xf32, #tpu.memory_space<vmem>>, vector<1x64x1xf32>
    %47 = vector.shape_cast %46 : vector<1x64x1xf32> to vector<64x1xf32>
    %c1_29 = arith.constant 1 : index
    %c64_30 = arith.constant 64 : index
    %c3_31 = arith.constant 3 : index
    %48 = vector.load %arg2[%c1_29, %c64_30, %c3_31] : memref<4x144x64xf32, #tpu.memory_space<vmem>>, vector<1x64x1xf32>
    %49 = vector.shape_cast %48 : vector<1x64x1xf32> to vector<64x1xf32>
    %c1_32 = arith.constant 1 : index
    %c64_33 = arith.constant 64 : index
    %c4_34 = arith.constant 4 : index
    %50 = vector.load %arg2[%c1_32, %c64_33, %c4_34] : memref<4x144x64xf32, #tpu.memory_space<vmem>>, vector<1x4x1xf32>
    %51 = vector.shape_cast %50 : vector<1x4x1xf32> to vector<4x1xf32>
    %c1_35 = arith.constant 1 : index
    %c128_36 = arith.constant 128 : index
    %c0_37 = arith.constant 0 : index
    %52 = vector.load %arg2[%c1_35, %c128_36, %c0_37] : memref<4x144x64xf32, #tpu.memory_space<vmem>>, vector<1x4x64xf32>
    %53 = vector.shape_cast %52 : vector<1x4x64xf32> to vector<4x64xf32>
    %cst_38 = arith.constant dense<0.000000e+00> : vector<64x128xf32>
    %54 = tpu.matmul %45, %38, %cst_38 {dimension_numbers = #tpu.dot_dimension_numbers<[1], [0], [0], [1], [0, 0, 1, 1], [], []>} : vector<64x2xf32>, vector<2x128xf32>, vector<64x128xf32> -> vector<64x128xf32>
    %55 = vector.broadcast %47 : vector<64x1xf32> to vector<64x128xf32>
    %56 = arith.addf %54, %55 : vector<64x128xf32>
    %cst_39 = arith.constant 0.00999999977 : f32
    %57 = vector.broadcast %cst_39 : f32 to vector<64x128xf32>
    %58 = arith.mulf %57, %56 : vector<64x128xf32>
    %59 = arith.maximumf %56, %58 : vector<64x128xf32>
    %cst_40 = arith.constant dense<0.000000e+00> : vector<64x128xf32>
    %60 = tpu.matmul %43, %59, %cst_40 {dimension_numbers = #tpu.dot_dimension_numbers<[1], [0], [0], [1], [0, 0, 1, 1], [], []>} : vector<64x64xf32>, vector<64x128xf32>, vector<64x128xf32> -> vector<64x128xf32>
    %61 = vector.broadcast %49 : vector<64x1xf32> to vector<64x128xf32>
    %62 = arith.addf %60, %61 : vector<64x128xf32>
    %cst_41 = arith.constant 0.00999999977 : f32
    %63 = vector.broadcast %cst_41 : f32 to vector<64x128xf32>
    %64 = arith.mulf %63, %62 : vector<64x128xf32>
    %65 = arith.maximumf %62, %64 : vector<64x128xf32>
    %cst_42 = arith.constant dense<0.000000e+00> : vector<4x128xf32>
    %66 = tpu.matmul %53, %65, %cst_42 {dimension_numbers = #tpu.dot_dimension_numbers<[1], [0], [0], [1], [0, 0, 1, 1], [], []>} : vector<4x64xf32>, vector<64x128xf32>, vector<4x128xf32> -> vector<4x128xf32>
    %67 = vector.broadcast %51 : vector<4x1xf32> to vector<4x128xf32>
    %68 = arith.addf %66, %67 : vector<4x128xf32>
    %69 = vector.extract_strided_slice %68 {offsets = [0, 0], sizes = [2, 128], strides = [1, 1]} : vector<4x128xf32> to vector<2x128xf32>
    %70 = math.tanh %69 : vector<2x128xf32>
    %71 = vector.extract_strided_slice %68 {offsets = [2, 0], sizes = [2, 128], strides = [1, 1]} : vector<4x128xf32> to vector<2x128xf32>
    %72 = arith.subf %1, %71 : vector<2x128xf32>
    %cst_43 = arith.constant 0.000000e+00 : f32
    %73 = vector.broadcast %cst_43 : f32 to vector<2x128xf32>
    %74 = arith.subf %73, %70 : vector<2x128xf32>
    %75 = math.exp %74 : vector<2x128xf32>
    %76 = arith.mulf %72, %75 : vector<2x128xf32>
    %cst_44 = arith.constant dense<0.000000e+00> : vector<128xf32>
    %77 = vector.multi_reduction <add>, %70, %cst_44 [0] : vector<2x128xf32> to vector<128xf32>
    %78 = vector.shape_cast %77 : vector<128xf32> to vector<1x128xf32>
    %79 = arith.subf %41, %78 : vector<1x128xf32>
    %c2_45 = arith.constant 2 : index
    %c0_46 = arith.constant 0 : index
    %c0_47 = arith.constant 0 : index
    %80 = vector.load %arg2[%c2_45, %c0_46, %c0_47] : memref<4x144x64xf32, #tpu.memory_space<vmem>>, vector<1x64x64xf32>
    %81 = vector.shape_cast %80 : vector<1x64x64xf32> to vector<64x64xf32>
    %c2_48 = arith.constant 2 : index
    %c64_49 = arith.constant 64 : index
    %c0_50 = arith.constant 0 : index
    %82 = vector.load %arg2[%c2_48, %c64_49, %c0_50] : memref<4x144x64xf32, #tpu.memory_space<vmem>>, vector<1x64x2xf32>
    %83 = vector.shape_cast %82 : vector<1x64x2xf32> to vector<64x2xf32>
    %c2_51 = arith.constant 2 : index
    %c64_52 = arith.constant 64 : index
    %c2_53 = arith.constant 2 : index
    %84 = vector.load %arg2[%c2_51, %c64_52, %c2_53] : memref<4x144x64xf32, #tpu.memory_space<vmem>>, vector<1x64x1xf32>
    %85 = vector.shape_cast %84 : vector<1x64x1xf32> to vector<64x1xf32>
    %c2_54 = arith.constant 2 : index
    %c64_55 = arith.constant 64 : index
    %c3_56 = arith.constant 3 : index
    %86 = vector.load %arg2[%c2_54, %c64_55, %c3_56] : memref<4x144x64xf32, #tpu.memory_space<vmem>>, vector<1x64x1xf32>
    %87 = vector.shape_cast %86 : vector<1x64x1xf32> to vector<64x1xf32>
    %c2_57 = arith.constant 2 : index
    %c64_58 = arith.constant 64 : index
    %c4_59 = arith.constant 4 : index
    %88 = vector.load %arg2[%c2_57, %c64_58, %c4_59] : memref<4x144x64xf32, #tpu.memory_space<vmem>>, vector<1x4x1xf32>
    %89 = vector.shape_cast %88 : vector<1x4x1xf32> to vector<4x1xf32>
    %c2_60 = arith.constant 2 : index
    %c128_61 = arith.constant 128 : index
    %c0_62 = arith.constant 0 : index
    %90 = vector.load %arg2[%c2_60, %c128_61, %c0_62] : memref<4x144x64xf32, #tpu.memory_space<vmem>>, vector<1x4x64xf32>
    %91 = vector.shape_cast %90 : vector<1x4x64xf32> to vector<4x64xf32>
    %cst_63 = arith.constant dense<0.000000e+00> : vector<64x128xf32>
    %92 = tpu.matmul %83, %76, %cst_63 {dimension_numbers = #tpu.dot_dimension_numbers<[1], [0], [0], [1], [0, 0, 1, 1], [], []>} : vector<64x2xf32>, vector<2x128xf32>, vector<64x128xf32> -> vector<64x128xf32>
    %93 = vector.broadcast %85 : vector<64x1xf32> to vector<64x128xf32>
    %94 = arith.addf %92, %93 : vector<64x128xf32>
    %cst_64 = arith.constant 0.00999999977 : f32
    %95 = vector.broadcast %cst_64 : f32 to vector<64x128xf32>
    %96 = arith.mulf %95, %94 : vector<64x128xf32>
    %97 = arith.maximumf %94, %96 : vector<64x128xf32>
    %cst_65 = arith.constant dense<0.000000e+00> : vector<64x128xf32>
    %98 = tpu.matmul %81, %97, %cst_65 {dimension_numbers = #tpu.dot_dimension_numbers<[1], [0], [0], [1], [0, 0, 1, 1], [], []>} : vector<64x64xf32>, vector<64x128xf32>, vector<64x128xf32> -> vector<64x128xf32>
    %99 = vector.broadcast %87 : vector<64x1xf32> to vector<64x128xf32>
    %100 = arith.addf %98, %99 : vector<64x128xf32>
    %cst_66 = arith.constant 0.00999999977 : f32
    %101 = vector.broadcast %cst_66 : f32 to vector<64x128xf32>
    %102 = arith.mulf %101, %100 : vector<64x128xf32>
    %103 = arith.maximumf %100, %102 : vector<64x128xf32>
    %cst_67 = arith.constant dense<0.000000e+00> : vector<4x128xf32>
    %104 = tpu.matmul %91, %103, %cst_67 {dimension_numbers = #tpu.dot_dimension_numbers<[1], [0], [0], [1], [0, 0, 1, 1], [], []>} : vector<4x64xf32>, vector<64x128xf32>, vector<4x128xf32> -> vector<4x128xf32>
    %105 = vector.broadcast %89 : vector<4x1xf32> to vector<4x128xf32>
    %106 = arith.addf %104, %105 : vector<4x128xf32>
    %107 = vector.extract_strided_slice %106 {offsets = [0, 0], sizes = [2, 128], strides = [1, 1]} : vector<4x128xf32> to vector<2x128xf32>
    %108 = math.tanh %107 : vector<2x128xf32>
    %109 = vector.extract_strided_slice %106 {offsets = [2, 0], sizes = [2, 128], strides = [1, 1]} : vector<4x128xf32> to vector<2x128xf32>
    %110 = arith.subf %38, %109 : vector<2x128xf32>
    %cst_68 = arith.constant 0.000000e+00 : f32
    %111 = vector.broadcast %cst_68 : f32 to vector<2x128xf32>
    %112 = arith.subf %111, %108 : vector<2x128xf32>
    %113 = math.exp %112 : vector<2x128xf32>
    %114 = arith.mulf %110, %113 : vector<2x128xf32>
    %cst_69 = arith.constant dense<0.000000e+00> : vector<128xf32>
    %115 = vector.multi_reduction <add>, %108, %cst_69 [0] : vector<2x128xf32> to vector<128xf32>
    %116 = vector.shape_cast %115 : vector<128xf32> to vector<1x128xf32>
    %117 = arith.subf %79, %116 : vector<1x128xf32>
    %c3_70 = arith.constant 3 : index
    %c0_71 = arith.constant 0 : index
    %c0_72 = arith.constant 0 : index
    %118 = vector.load %arg2[%c3_70, %c0_71, %c0_72] : memref<4x144x64xf32, #tpu.memory_space<vmem>>, vector<1x64x64xf32>
    %119 = vector.shape_cast %118 : vector<1x64x64xf32> to vector<64x64xf32>
    %c3_73 = arith.constant 3 : index
    %c64_74 = arith.constant 64 : index
    %c0_75 = arith.constant 0 : index
    %120 = vector.load %arg2[%c3_73, %c64_74, %c0_75] : memref<4x144x64xf32, #tpu.memory_space<vmem>>, vector<1x64x2xf32>
    %121 = vector.shape_cast %120 : vector<1x64x2xf32> to vector<64x2xf32>
    %c3_76 = arith.constant 3 : index
    %c64_77 = arith.constant 64 : index
    %c2_78 = arith.constant 2 : index
    %122 = vector.load %arg2[%c3_76, %c64_77, %c2_78] : memref<4x144x64xf32, #tpu.memory_space<vmem>>, vector<1x64x1xf32>
    %123 = vector.shape_cast %122 : vector<1x64x1xf32> to vector<64x1xf32>
    %c3_79 = arith.constant 3 : index
    %c64_80 = arith.constant 64 : index
    %c3_81 = arith.constant 3 : index
    %124 = vector.load %arg2[%c3_79, %c64_80, %c3_81] : memref<4x144x64xf32, #tpu.memory_space<vmem>>, vector<1x64x1xf32>
    %125 = vector.shape_cast %124 : vector<1x64x1xf32> to vector<64x1xf32>
    %c3_82 = arith.constant 3 : index
    %c64_83 = arith.constant 64 : index
    %c4_84 = arith.constant 4 : index
    %126 = vector.load %arg2[%c3_82, %c64_83, %c4_84] : memref<4x144x64xf32, #tpu.memory_space<vmem>>, vector<1x4x1xf32>
    %127 = vector.shape_cast %126 : vector<1x4x1xf32> to vector<4x1xf32>
    %c3_85 = arith.constant 3 : index
    %c128_86 = arith.constant 128 : index
    %c0_87 = arith.constant 0 : index
    %128 = vector.load %arg2[%c3_85, %c128_86, %c0_87] : memref<4x144x64xf32, #tpu.memory_space<vmem>>, vector<1x4x64xf32>
    %129 = vector.shape_cast %128 : vector<1x4x64xf32> to vector<4x64xf32>
    %cst_88 = arith.constant dense<0.000000e+00> : vector<64x128xf32>
    %130 = tpu.matmul %121, %114, %cst_88 {dimension_numbers = #tpu.dot_dimension_numbers<[1], [0], [0], [1], [0, 0, 1, 1], [], []>} : vector<64x2xf32>, vector<2x128xf32>, vector<64x128xf32> -> vector<64x128xf32>
    %131 = vector.broadcast %123 : vector<64x1xf32> to vector<64x128xf32>
    %132 = arith.addf %130, %131 : vector<64x128xf32>
    %cst_89 = arith.constant 0.00999999977 : f32
    %133 = vector.broadcast %cst_89 : f32 to vector<64x128xf32>
    %134 = arith.mulf %133, %132 : vector<64x128xf32>
    %135 = arith.maximumf %132, %134 : vector<64x128xf32>
    %cst_90 = arith.constant dense<0.000000e+00> : vector<64x128xf32>
    %136 = tpu.matmul %119, %135, %cst_90 {dimension_numbers = #tpu.dot_dimension_numbers<[1], [0], [0], [1], [0, 0, 1, 1], [], []>} : vector<64x64xf32>, vector<64x128xf32>, vector<64x128xf32> -> vector<64x128xf32>
    %137 = vector.broadcast %125 : vector<64x1xf32> to vector<64x128xf32>
    %138 = arith.addf %136, %137 : vector<64x128xf32>
    %cst_91 = arith.constant 0.00999999977 : f32
    %139 = vector.broadcast %cst_91 : f32 to vector<64x128xf32>
    %140 = arith.mulf %139, %138 : vector<64x128xf32>
    %141 = arith.maximumf %138, %140 : vector<64x128xf32>
    %cst_92 = arith.constant dense<0.000000e+00> : vector<4x128xf32>
    %142 = tpu.matmul %129, %141, %cst_92 {dimension_numbers = #tpu.dot_dimension_numbers<[1], [0], [0], [1], [0, 0, 1, 1], [], []>} : vector<4x64xf32>, vector<64x128xf32>, vector<4x128xf32> -> vector<4x128xf32>
    %143 = vector.broadcast %127 : vector<4x1xf32> to vector<4x128xf32>
    %144 = arith.addf %142, %143 : vector<4x128xf32>
    %145 = vector.extract_strided_slice %144 {offsets = [0, 0], sizes = [2, 128], strides = [1, 1]} : vector<4x128xf32> to vector<2x128xf32>
    %146 = math.tanh %145 : vector<2x128xf32>
    %147 = vector.extract_strided_slice %144 {offsets = [2, 0], sizes = [2, 128], strides = [1, 1]} : vector<4x128xf32> to vector<2x128xf32>
    %148 = arith.subf %76, %147 : vector<2x128xf32>
    %cst_93 = arith.constant 0.000000e+00 : f32
    %149 = vector.broadcast %cst_93 : f32 to vector<2x128xf32>
    %150 = arith.subf %149, %146 : vector<2x128xf32>
    %151 = math.exp %150 : vector<2x128xf32>
    %152 = arith.mulf %148, %151 : vector<2x128xf32>
    %cst_94 = arith.constant dense<0.000000e+00> : vector<128xf32>
    %153 = vector.multi_reduction <add>, %146, %cst_94 [0] : vector<2x128xf32> to vector<128xf32>
    %154 = vector.shape_cast %153 : vector<128xf32> to vector<1x128xf32>
    %155 = arith.subf %117, %154 : vector<1x128xf32>
    %156 = arith.mulf %152, %152 : vector<2x128xf32>
    %cst_95 = arith.constant dense<0.000000e+00> : vector<128xf32>
    %157 = vector.multi_reduction <add>, %156, %cst_95 [0] : vector<2x128xf32> to vector<128xf32>
    %158 = vector.shape_cast %157 : vector<128xf32> to vector<1x128xf32>
    %159 = arith.mulf %114, %114 : vector<2x128xf32>
    %cst_96 = arith.constant dense<0.000000e+00> : vector<128xf32>
    %160 = vector.multi_reduction <add>, %159, %cst_96 [0] : vector<2x128xf32> to vector<128xf32>
    %161 = vector.shape_cast %160 : vector<128xf32> to vector<1x128xf32>
    %162 = arith.addf %158, %161 : vector<1x128xf32>
    %cst_97 = arith.constant -5.000000e-01 : f32
    %163 = vector.broadcast %cst_97 : f32 to vector<1x128xf32>
    %164 = arith.mulf %163, %162 : vector<1x128xf32>
    %cst_98 = arith.constant -3.67575407 : f32
    %165 = vector.broadcast %cst_98 : f32 to vector<1x128xf32>
    %166 = arith.addf %164, %165 : vector<1x128xf32>
    %167 = arith.addf %166, %155 : vector<1x128xf32>
    %cst_99 = arith.constant 0.000000e+00 : f32
    %168 = vector.broadcast %cst_99 : f32 to vector<1x128xf32>
    %169 = arith.subf %168, %167 : vector<1x128xf32>
    %c0_100 = arith.constant 0 : index
    %c0_101 = arith.constant 0 : index
    %170 = vector.load %arg3[%c0_100, %c0_101] : memref<1x128xf32, #tpu.memory_space<vmem>>, vector<1x128xf32>
    tpu.vector_store %arg3[%c0_100, %c0_101], %169 {strides = array<i32>} : memref<1x128xf32, #tpu.memory_space<vmem>>, vector<1x128xf32>,
    return
  }
  func.func @transform_0(%arg0: i32) -> (i32, i32) {
    %c0_i32 = arith.constant 0 : i32
    %c0_i32_0 = arith.constant 0 : i32
    return %c0_i32, %arg0 : i32, i32
  }
  func.func @transform_1(%arg0: i32) -> (i32, i32, i32) {
    %c0_i32 = arith.constant 0 : i32
    %c0_i32_0 = arith.constant 0 : i32
    %c0_i32_1 = arith.constant 0 : i32
    %c0_i32_2 = arith.constant 0 : i32
    return %c0_i32, %c0_i32_0, %c0_i32_1 : i32, i32, i32
  }
  func.func @transform_2(%arg0: i32) -> (i32, i32) {
    %c0_i32 = arith.constant 0 : i32
    %c0_i32_0 = arith.constant 0 : i32
    return %c0_i32, %arg0 : i32, i32
  }
}

</mosaic_0001>

<bundles_post_ra>
// kernel: tpu_custom_call.1
= control target key start
LH: loop header
LB: loop body
LE: loop exit
PB: predicated region body
PF: predicated region fallthrough
CT: control target
= control target key end

     0   :  { %vm88_vm0 = vcmask 1041408   ;;  %vm71_vm1 = vcmask 15360   ;;  %v2625_v4 = vmov 2   ;;  %s3037_s0 = inlined_call_operand.vmem [shape: f32[4,128], index: 0, kind: input, shape index: {}]   ;;  %s3038_s1 = inlined_call_operand.vmem [shape: f32[4,144,64], index: 1, kind: input, shape index: {}]   ;;  %s3039_s2 = inlined_call_operand.hbm [shape: f32[1,128], index: 2, kind: output, shape index: {}]  }
   0x1   :  { %v2650_v0 = vld [vmem:[%s3037_s0] sm:$0xf]  ;;  %v22_v2 = vld [vmem:[%s3038_s1 + $0x48] sm:$0xff]  ;;  %v23_v3 = vld [vmem:[%s3038_s1 + $0x50] sm:$0xff]  ;;  %2565 = vset.pattern.permute.xlu0 %v2625_v4 }
   0x2   :  { %v21_v1 = vld [vmem:[%s3038_s1 + $0x40] sm:$0xff]  ;;  %2202 = vmatprep.subr.msk.mxu0 %vm88_vm0, %v2650_v0 }
   0x3   :  { %2204 = vmatprep.mubr.msk.f32.mxu0 %vm71_vm1, %v21_v1  ;;  %2203 = vmatpush3.msk.msra.mxu0 %vm88_vm0, %v2650_v0 }
   0x4   :  { %2205 = vmatmul.mubr.msk.f32.vlgmr.msra.gmra.mrb[0].mxu0 %vm71_vm1, %v22_v2  ;;  %33 = vperm.xlu0 %2565, %v21_v1  }
   0x5   :  { %7 = vsyncpa [#allocation3], 0  ;;  %2207 = vmatprep.mubr.msk.f32.mxu0 %vm71_vm1, %v23_v3  ;;  %v24_v5 = vld [vmem:[%s3038_s1 + $0x58] sm:$0xff]  ;;  %2566 = vset.pattern.permute.xlu1 %v2625_v4  ;;  %v25_v6 = vld [vmem:[%s3038_s1 + $0x60] sm:$0xff]  ;;  %vm245_vm2 = vcmask 523264   ;;  %v2626_v11 = vmov 3  }
   0x6   :  { %43 = vperm.xlu1 %2566, %v23_v3   ;;  %v26_v7 = vld [vmem:[%s3038_s1 + $0x68] sm:$0xff]  ;;  %v27_v8 = vld [vmem:[%s3038_s1 + $0x70] sm:$0xff]  ;;  %v28_v9 = vld [vmem:[%s3038_s1 + $0x78] sm:$0xff]  ;;  %v2627_v63 = vmov 0.0|0.0   ;;  %vm2628_vm3 = vmmov 0  }
   0x7   :  { %v13_v10 = vld [vmem:[%s3038_s1] sm:$0xff]  ;;  %v14_v56 = vld [vmem:[%s3038_s1 + $0x8] sm:$0xff]  ;;  %v15_v57 = vld [vmem:[%s3038_s1 + $0x10] sm:$0xff]  ;;  %2462 = vmatprep.subr.bf16.mxu0 %v2627_v63 }
   0x8   :  { %2208 = vmatmul.mubr.msk.f32.gmra.mrb[2].mxu0 %vm71_vm1, %v24_v5  ;;  %38 = vperm.xlu0 %2565, %v22_v2   ;;  %v16_v58 = vld [vmem:[%s3038_s1 + $0x18] sm:$0xff]  ;;  %v17_v59 = vld [vmem:[%s3038_s1 + $0x20] sm:$0xff]  ;;  %v18_v60 = vld [vmem:[%s3038_s1 + $0x28] sm:$0xff] }
   0x9   :  { %2210 = vmatprep.mubr.msk.f32.mxu0 %vm71_vm1, %v25_v6  ;;  %2232 = vmatprep.mubr.msk.f32.mxu1 %vm245_vm2, %v13_v10  ;;  %v19_v61 = vld [vmem:[%s3038_s1 + $0x30] sm:$0xff]  ;;  %v20_v62 = vld [vmem:[%s3038_s1 + $0x38] sm:$0xff] }
   0xa   :  { %48 = vperm.xlu1 %2566, %v24_v5  }
   0xc   :  { %2211 = vmatmul.mubr.msk.f32.gmra.mrb[4].mxu0 %vm71_vm1, %v26_v7  ;;  %53 = vperm.xlu0 %2565, %v25_v6  }
   0xd   :  { %2213 = vmatprep.mubr.msk.f32.mxu0 %vm71_vm1, %v27_v8 }
   0xe   :  { %58 = vperm.xlu1 %2566, %v26_v7  }
  0x10   :  { %2214 = vmatmul.mubr.msk.f32.gmra.mrb[6].mxu0 %vm71_vm1, %v28_v9  ;;  %63 = vperm.xlu0 %2565, %v27_v8  }
  0x12   :  { %68 = vperm.xlu1 %2566, %v28_v9  }
  0x14   :  { %2567 = vset.pattern.permute.xlu0 %v2626_v11 }
  0x15   :  { %214 = vperm.xlu0 %2567, %v21_v1   ;;  %v2629_v1 = vmov 0.0  }
  0x16   :  { %2568 = vset.pattern.permute.xlu1 %v2626_v11  ;;  %2260 = vmatprep.mubr.msk.f32.mxu0 %vm2628_vm3, %v2629_v1 }
  0x17   :  { %218 = vperm.xlu1 %2568, %v22_v2   ;;  %v29_v2 = vld [vmem:[%s3038_s1 + $0x40] sm:$0xf] }
  0x19   :  { %226 = vperm.xlu0 %2567, %v24_v5  }
  0x1b   :  { %222 = vperm.xlu1 %2568, %v23_v3   ;;  %v2630_v3 = vmov 4  }
  0x1d   :  { %234 = vperm.xlu0 %2567, %v26_v7  }
  0x1f   :  { %230 = vperm.xlu1 %2568, %v25_v6  }
  0x21   :  { %242 = vperm.xlu0 %2567, %v28_v9  }
  0x23   :  { %238 = vperm.xlu1 %2568, %v27_v8  }
  0x25   :  { %2570 = vset.pattern.permute.xlu0 %v2625_v4 }
  0x27   :  { %2569 = vset.pattern.permute.xlu1 %v2630_v3 }
  0x28   :  { %393 = vperm.xlu1 %2569, %v29_v2  }
  0x2c   :  { %2571 = vset.pattern.permute.xlu1 %v2625_v4 }
  0x83   :  { %v34_v12 = vpop.permute.xlu0 %33 }
  0x85   :  { %v44_v13 = vpop.permute.xlu1 %43 }
  0x87   :  { %v39_v14 = vpop.permute.xlu0 %38 }
  0x89   :  { %v49_v15 = vpop.permute.xlu1 %48 }
  0x8b   :  { %v54_v29 = vpop.permute.xlu0 %53 }
  0x8d   :  { %v59_v26 = vpop.permute.xlu1 %58 }
  0x8f   :  { %v64_v44 = vpop.permute.xlu0 %63 }
  0x91   :  { %v69_v40 = vpop.permute.xlu1 %68 }
  0x94   :  { %v215_v5 = vpop.permute.xlu0 %214 }
  0x96   :  { %v219_v6 = vpop.permute.xlu1 %218 }
  0x98   :  { %v227_v7 = vpop.permute.xlu0 %226 }
  0x9a   :  { %v223_v9 = vpop.permute.xlu1 %222 }
  0xd7   :  { %v2206_v16 = vpop.f32.mrb[0].mxu0 }
  0xd8   :  { %v164_v17 = vadd.f32 %v2206_v16, %v39_v14  ;;  %v158_v18 = vpop.f32.mrb[1].mxu0 }
  0xd9   :  { %v159_v19 = vadd.f32 %v158_v18, %v34_v12 }
  0xda   :  { %v198_v20 = vmul.f32 0.01, %v164_v17 }
  0xdb   :  { %v197_v21 = vmul.f32 0.01, %v159_v19  ;;  %v2209_v22 = vpop.f32.mrb[2].mxu0 }
  0xdc   :  { %v206_v23 = vmax.f32 %v164_v17, %v198_v20  ;;  %v174_v24 = vadd.f32 %v2209_v22, %v49_v15  ;;  %v168_v25 = vpop.f32.mrb[3].mxu0  ;;  %v235_v20 = vpop.permute.xlu0 %234 }
  0xdd   :  { %v205_v27 = vmax.f32 %v159_v19, %v197_v21  ;;  %v169_v28 = vadd.f32 %v168_v25, %v44_v13 }
  0xde   :  { %v200_v30 = vmul.f32 0.01, %v174_v24 }
  0xdf   :  { %v199_v31 = vmul.f32 0.01, %v169_v28  ;;  %v2212_v32 = vpop.f32.mrb[4].mxu0  ;;  %v2446_v33 = vpack.c.bf16 %v206_v23, %v205_v27  ;;  %v231_v23 = vpop.permute.xlu1 %230 }
  0xe0   :  { %v208_v34 = vmax.f32 %v174_v24, %v200_v30  ;;  %v184_v35 = vadd.f32 %v2212_v32, %v59_v26  ;;  %v178_v36 = vpop.f32.mrb[5].mxu0 }
  0xe1   :  { %v207_v37 = vmax.f32 %v169_v28, %v199_v31  ;;  %v179_v38 = vadd.f32 %v178_v36, %v54_v29  ;;  %2447 = vmatprep.subr.bf16.mxu1 %v2446_v33 }
  0xe2   :  { %v202_v39 = vmul.f32 0.01, %v184_v35  ;;  %2449 = vmatpush3.bf16.msra.mxu1 %v2446_v33 }
  0xe3   :  { %v201_v41 = vmul.f32 0.01, %v179_v38  ;;  %v2215_v42 = vpop.f32.mrb[6].mxu0  ;;  %v2450_v43 = vpack.c.bf16 %v208_v34, %v207_v37  ;;  %v243_v34 = vpop.permute.xlu0 %242 }
  0xe4   :  { %v210_v45 = vmax.f32 %v184_v35, %v202_v39  ;;  %v194_v46 = vadd.f32 %v2215_v42, %v69_v40  ;;  %v188_v47 = vpop.f32.mrb[7].mxu0 }
  0xe5   :  { %v209_v48 = vmax.f32 %v179_v38, %v201_v41  ;;  %v189_v49 = vadd.f32 %v188_v47, %v64_v44  ;;  %2451 = vmatprep.subr.bf16.mxu1 %v2450_v43  ;;  %v239_v38 = vpop.permute.xlu1 %238 }
  0xe6   :  { %v204_v50 = vmul.f32 0.01, %v194_v46  ;;  %2453 = vmatpush3.bf16.msra.mxu1 %v2450_v43 }
  0xe7   :  { %v203_v51 = vmul.f32 0.01, %v189_v49  ;;  %v2454_v52 = vpack.c.bf16 %v210_v45, %v209_v48 }
  0xe8   :  { %v212_v53 = vmax.f32 %v194_v46, %v204_v50  ;;  %v30_v50 = vld [vmem:[%s3038_s1 + $0x80] sm:$0xf] }
  0xe9   :  { %v211_v54 = vmax.f32 %v189_v49, %v203_v51  ;;  %2455 = vmatprep.subr.bf16.mxu1 %v2454_v52  ;;  %v1966_v51 = vld [vmem:[%s3038_s1 + $0xd0] sm:$0xff] }
  0xea   :  { %2457 = vmatpush3.bf16.msra.mxu1 %v2454_v52  ;;  %v1967_v52 = vld [vmem:[%s3038_s1 + $0xd8] sm:$0xff]  ;;  %507 = vperm.xlu0 %2570, %v1966_v51  }
  0xeb   :  { %v2458_v55 = vpack.c.bf16 %v212_v53, %v211_v54  ;;  %512 = vperm.xlu1 %2571, %v1967_v52   ;;  %v1969_v53 = vld [vmem:[%s3038_s1 + $0xe8] sm:$0xff]  ;;  %v1968_v54 = vld [vmem:[%s3038_s1 + $0xe0] sm:$0xff] }
  0xed   :  { %2459 = vmatprep.subr.bf16.mxu1 %v2458_v55 }
  0xee   :  { %2461 = vmatpush3.bf16.msra.mxu1 %v2458_v55  ;;  %522 = vperm.xlu0 %2570, %v1969_v53   ;;  %v1971_v55 = vld [vmem:[%s3038_s1 + $0xf8] sm:$0xff] }
  0xef   :  { %517 = vperm.xlu1 %2571, %v1968_v54  }
  0xf1   :  { %2233 = vmatmul.mubr.msk.f32.vlgmr.msra.gmra.mrb[0].mxu1 %vm245_vm2, %v14_v56  ;;  %v1970_v56 = vld [vmem:[%s3038_s1 + $0xf0] sm:$0xff] }
  0xf2   :  { %2235 = vmatprep.mubr.msk.f32.mxu1 %vm245_vm2, %v15_v57  ;;  %532 = vperm.xlu0 %2570, %v1971_v55   ;;  %v1973_v57 = vld [vmem:[%s3038_s1 + $0x108] sm:$0xff] }
  0xf3   :  { %527 = vperm.xlu1 %2571, %v1970_v56  }
  0xf5   :  { %2236 = vmatmul.mubr.msk.f32.gmra.mrb[2].mxu1 %vm245_vm2, %v16_v58  ;;  %v1972_v58 = vld [vmem:[%s3038_s1 + $0x100] sm:$0xff] }
  0xf6   :  { %2238 = vmatprep.mubr.msk.f32.mxu1 %vm245_vm2, %v17_v59  ;;  %542 = vperm.xlu0 %2570, %v1973_v57   ;;  %v394_v59 = vpop.permute.xlu1 %393 }
  0xf7   :  { %537 = vperm.xlu1 %2571, %v1972_v58  }
  0xf9   :  { %2239 = vmatmul.mubr.msk.f32.gmra.mrb[4].mxu1 %vm245_vm2, %v18_v60 }
  0xfa   :  { %2241 = vmatprep.mubr.msk.f32.mxu1 %vm245_vm2, %v19_v61  ;;  %2573 = vset.pattern.permute.xlu0 %v2626_v11 }
  0xfb   :  { %2572 = vset.pattern.permute.xlu1 %v2626_v11  ;;  %691 = vperm.xlu0 %2573, %v1967_v52  }
  0xfc   :  { %687 = vperm.xlu1 %2572, %v1966_v51  }
  0xfd   :  { %2242 = vmatmul.mubr.msk.f32.gmra.mrb[6].mxu1 %vm245_vm2, %v20_v62 }
  0xff   :  { %703 = vperm.xlu0 %2573, %v1970_v56  }
 0x100   :  { %695 = vperm.xlu1 %2572, %v1968_v54  }
 0x103   :  { %711 = vperm.xlu0 %2573, %v1972_v58  }
 0x104   :  { %699 = vperm.xlu1 %2572, %v1969_v53  }
 0x107   :  { %2574 = vset.pattern.permute.xlu0 %v2630_v3 }
 0x108   :  { %707 = vperm.xlu1 %2572, %v1971_v55  }
 0x10c   :  { %715 = vperm.xlu1 %2572, %v1973_v57  }
 0x110   :  { %2575 = vset.pattern.permute.xlu1 %v2625_v4 }
 0x1c4   :  { %v2234_v8 = vpop.f32.mrb[0].mxu1 }
 0x1c5   :  { %v342_v10 = vadd.f32 %v2234_v8, %v219_v6  ;;  %v336_v12 = vpop.f32.mrb[1].mxu1 }
 0x1c6   :  { %v337_v13 = vadd.f32 %v336_v12, %v215_v5 }
 0x1c7   :  { %v376_v14 = vmul.f32 0.01, %v342_v10 }
 0x1c8   :  { %v375_v15 = vmul.f32 0.01, %v337_v13  ;;  %v2237_v16 = vpop.f32.mrb[2].mxu1 }
 0x1c9   :  { %v384_v17 = vmax.f32 %v342_v10, %v376_v14  ;;  %v352_v18 = vadd.f32 %v2237_v16, %v227_v7  ;;  %v346_v19 = vpop.f32.mrb[3].mxu1  ;;  %v508_v14 = vpop.permute.xlu0 %507 }
 0x1ca   :  { %v383_v21 = vmax.f32 %v337_v13, %v375_v15  ;;  %v347_v22 = vadd.f32 %v346_v19, %v223_v9  ;;  %v1958_v13 = vld [vmem:[%s3038_s1 + $0x90] sm:$0xff]  ;;  %v513_v15 = vpop.permute.xlu1 %512 }
 0x1cb   :  { %v378_v24 = vmul.f32 0.01, %v352_v18  ;;  %2293 = vmatprep.mubr.msk.f32.mxu1 %vm245_vm2, %v1958_v13 }
 0x1cc   :  { %v2463_v25 = vpack.c.bf16 %v384_v17, %v383_v21  ;;  %v377_v26 = vmul.f32 0.01, %v347_v22  ;;  %v2240_v27 = vpop.f32.mrb[4].mxu1 }
 0x1cd   :  { %v386_v28 = vmax.f32 %v352_v18, %v378_v24  ;;  %v362_v29 = vadd.f32 %v2240_v27, %v235_v20  ;;  %v356_v30 = vpop.f32.mrb[5].mxu1  ;;  %v523_v16 = vpop.permute.xlu0 %522 }
 0x1ce   :  { %v385_v31 = vmax.f32 %v347_v22, %v377_v26  ;;  %v357_v32 = vadd.f32 %v356_v30, %v231_v23  ;;  %2464 = vmatpush3.bf16.msra.mxu0 %v2463_v25  ;;  %v518_v18 = vpop.permute.xlu1 %517 }
 0x1cf   :  { %v380_v33 = vmul.f32 0.01, %v362_v29  ;;  %2465 = vmatprep.subr.bf16.mxu0 %v2627_v63 }
 0x1d0   :  { %v2466_v35 = vpack.c.bf16 %v386_v28, %v385_v31  ;;  %v379_v36 = vmul.f32 0.01, %v357_v32  ;;  %v2243_v37 = vpop.f32.mrb[6].mxu1 }
 0x1d1   :  { %v388_v39 = vmax.f32 %v362_v29, %v380_v33  ;;  %v372_v40 = vadd.f32 %v2243_v37, %v243_v34  ;;  %v366_v41 = vpop.f32.mrb[7].mxu1  ;;  %v533_v28 = vpop.permute.xlu0 %532 }
 0x1d2   :  { %v387_v42 = vmax.f32 %v357_v32, %v379_v36  ;;  %v367_v43 = vadd.f32 %v366_v41, %v239_v38  ;;  %2467 = vmatpush3.bf16.msra.mxu0 %v2466_v35  ;;  %v528_v31 = vpop.permute.xlu1 %527 }
 0x1d3   :  { %v382_v44 = vmul.f32 0.01, %v372_v40  ;;  %2468 = vmatprep.subr.bf16.mxu0 %v2627_v63 }
 0x1d4   :  { %v2469_v45 = vpack.c.bf16 %v388_v39, %v387_v42  ;;  %v381_v46 = vmul.f32 0.01, %v367_v43 }
 0x1d5   :  { %v390_v47 = vmax.f32 %v372_v40, %v382_v44  ;;  %v543_v42 = vpop.permute.xlu0 %542 }
 0x1d6   :  { %v389_v48 = vmax.f32 %v367_v43, %v381_v46  ;;  %2470 = vmatpush3.bf16.msra.mxu0 %v2469_v45  ;;  %v538_v46 = vpop.permute.xlu1 %537 }
 0x1d7   :  { %2471 = vmatprep.subr.bf16.mxu0 %v2627_v63 }
 0x1d8   :  { %v2472_v49 = vpack.c.bf16 %v390_v47, %v389_v48 }
 0x1da   :  { %2473 = vmatpush3.bf16.msra.mxu0 %v2472_v49 }
 0x1dd   :  { %2261 = vmatmul.mubr.msk.f32.vlgmr.msra.gmra.mrb[8].mxu0 %vm245_vm2, %v30_v50 }
 0x1de   :  { %2265 = vmatprep.mubr.msk.f32.mxu0 %vm71_vm1, %v1966_v51 }
 0x2b0   :  { %v465_v60 = vpop.f32.mrb[8].mxu0 }
 0x2b1   :  { %v466_v61 = vadd.f32 %v465_v60, %v394_v59  ;;  %v2262_v62 = vpop.f32.mrb[9].mxu0  ;;  %v1960_v59 = vld [vmem:[%s3038_s1 + $0xa0] sm:$0xff]  ;;  %v1961_v60 = vld [vmem:[%s3038_s1 + $0xa8] sm:$0xff] }
 0x2b2   :  { %v1963_v62 = vld [vmem:[%s3038_s1 + $0xb8] sm:$0xff] }
 0x2b3   :  { %2585 = vtanh.f32 %v466_v61  ;;  %v470_v8 = vsub.f32 %v2650_v0, %v466_v61  ;;  %v1962_v61 = vld [vmem:[%s3038_s1 + $0xb0] sm:$0xff] }
 0x2bd   :  { %v2769_v2 = vpop.eup %2585 }
 0x2be   :  { %v471_v5 = vsub.f32 0.0, %v2769_v2 }
 0x2c0   :  { %v472_v6 = vmul.f32 1.442695, %v471_v5  ;;  %v1964_v5 = vld [vmem:[%s3038_s1 + $0xc0] sm:$0xff] }
 0x2c2   :  { %2587 = vpow2.f32 %v472_v6  ;;  %v1965_v6 = vld [vmem:[%s3038_s1 + $0xc8] sm:$0xff] }
 0x2cc   :  { %v2588_v7 = vpop.eup %2587 }
 0x2cd   :  { %v475_v9 = vrot.slane %v2588_v7, 6  ;;  %v1974_v7 = vld [vmem:[%s3038_s1 + $0xd0] sm:$0xf] }
 0x2ce   :  { %865 = vperm.xlu0 %2574, %v1974_v7  }
 0x2cf   :  { %v2773_v10 = vmul.f32 %v475_v9, %v470_v8  ;;  %v688_v8 = vpop.permute.xlu1 %687 }
 0x2d1   :  { %v546_v12 = vrot.slane %v2773_v10, 2 }
 0x2d2   :  { %2576 = vset.pattern.permute.xlu0 %v2625_v4 }
 0x2d3   :  { %2263 = vmatprep.subr.msk.mxu0 %vm88_vm0, %v546_v12  ;;  %v696_v9 = vpop.permute.xlu1 %695 }
 0x2d4   :  { %2264 = vmatpush3.msk.msra.mxu0 %vm88_vm0, %v546_v12  ;;  %v692_v12 = vpop.permute.xlu0 %691 }
 0x2d5   :  { %2266 = vmatmul.mubr.msk.f32.vlgmr.msra.gmra.mrb[10].mxu0 %vm71_vm1, %v1967_v52  ;;  %2490 = vmatprep.subr.bf16.mxu0 %v2627_v63 }
 0x2d6   :  { %2268 = vmatprep.mubr.msk.f32.mxu0 %vm71_vm1, %v1968_v54 }
 0x2d7   :  { %v700_v13 = vpop.permute.xlu1 %699 }
 0x2d9   :  { %2269 = vmatmul.mubr.msk.f32.gmra.mrb[12].mxu0 %vm71_vm1, %v1969_v53 }
 0x2da   :  { %2271 = vmatprep.mubr.msk.f32.mxu0 %vm71_vm1, %v1970_v56 }
 0x2dd   :  { %2272 = vmatmul.mubr.msk.f32.gmra.mrb[14].mxu0 %vm71_vm1, %v1971_v55 }
 0x2de   :  { %2274 = vmatprep.mubr.msk.f32.mxu0 %vm71_vm1, %v1972_v58  ;;  %v1959_v58 = vld [vmem:[%s3038_s1 + $0x98] sm:$0xff] }
 0x2e1   :  { %2275 = vmatmul.mubr.msk.f32.gmra.mrb[16].mxu0 %vm71_vm1, %v1973_v57 }
 0x2e2   :  { %2321 = vmatprep.mubr.msk.f32.mxu0 %vm2628_vm3, %v2629_v1 }
 0x3a8   :  { %v2267_v17 = vpop.f32.mrb[10].mxu0 }
 0x3a9   :  { %v637_v19 = vadd.f32 %v2267_v17, %v513_v15  ;;  %v631_v20 = vpop.f32.mrb[11].mxu0 }
 0x3aa   :  { %v632_v21 = vadd.f32 %v631_v20, %v508_v14 }
 0x3ab   :  { %v671_v22 = vmul.f32 0.01, %v637_v19 }
 0x3ac   :  { %v670_v23 = vmul.f32 0.01, %v632_v21  ;;  %v2270_v24 = vpop.f32.mrb[12].mxu0 }
 0x3ad   :  { %v679_v25 = vmax.f32 %v637_v19, %v671_v22  ;;  %v647_v26 = vadd.f32 %v2270_v24, %v523_v16  ;;  %v641_v27 = vpop.f32.mrb[13].mxu0  ;;  %v708_v24 = vpop.permute.xlu1 %707 }
 0x3ae   :  { %v678_v29 = vmax.f32 %v632_v21, %v670_v23  ;;  %v642_v30 = vadd.f32 %v641_v27, %v518_v18  ;;  %v704_v27 = vpop.permute.xlu0 %703 }
 0x3af   :  { %v673_v32 = vmul.f32 0.01, %v647_v26 }
 0x3b0   :  { %v672_v33 = vmul.f32 0.01, %v642_v30  ;;  %v2273_v34 = vpop.f32.mrb[14].mxu0  ;;  %v2474_v35 = vpack.c.bf16 %v679_v25, %v678_v29 }
 0x3b1   :  { %v681_v36 = vmax.f32 %v647_v26, %v673_v32  ;;  %v657_v37 = vadd.f32 %v2273_v34, %v533_v28  ;;  %v651_v38 = vpop.f32.mrb[15].mxu0 }
 0x3b2   :  { %v680_v39 = vmax.f32 %v642_v30, %v672_v33  ;;  %v652_v40 = vadd.f32 %v651_v38, %v528_v31  ;;  %2475 = vmatprep.subr.bf16.mxu1 %v2474_v35  ;;  %v716_v38 = vpop.permute.xlu1 %715 }
 0x3b3   :  { %v675_v41 = vmul.f32 0.01, %v657_v37  ;;  %2477 = vmatpush3.bf16.msra.mxu1 %v2474_v35 }
 0x3b4   :  { %v674_v43 = vmul.f32 0.01, %v652_v40  ;;  %v2276_v44 = vpop.f32.mrb[16].mxu0  ;;  %v2478_v45 = vpack.c.bf16 %v681_v36, %v680_v39 }
 0x3b5   :  { %v683_v47 = vmax.f32 %v657_v37, %v675_v41  ;;  %v667_v48 = vadd.f32 %v2276_v44, %v543_v42  ;;  %v661_v49 = vpop.f32.mrb[17].mxu0  ;;  %v712_v42 = vpop.permute.xlu0 %711 }
 0x3b6   :  { %v682_v50 = vmax.f32 %v652_v40, %v674_v43  ;;  %v662_v51 = vadd.f32 %v661_v49, %v538_v46  ;;  %2479 = vmatprep.subr.bf16.mxu1 %v2478_v45 }
 0x3b7   :  { %v677_v52 = vmul.f32 0.01, %v667_v48  ;;  %2481 = vmatpush3.bf16.msra.mxu1 %v2478_v45 }
 0x3b8   :  { %v676_v53 = vmul.f32 0.01, %v662_v51  ;;  %v2482_v54 = vpack.c.bf16 %v683_v47, %v682_v50 }
 0x3b9   :  { %v685_v55 = vmax.f32 %v667_v48, %v677_v52 }
 0x3ba   :  { %v684_v56 = vmax.f32 %v662_v51, %v676_v53  ;;  %2483 = vmatprep.subr.bf16.mxu1 %v2482_v54 }
 0x3bb   :  { %2485 = vmatpush3.bf16.msra.mxu1 %v2482_v54  ;;  %v1975_v54 = vld [vmem:[%s3038_s1 + $0x110] sm:$0xf] }
 0x3bc   :  { %v2486_v57 = vpack.c.bf16 %v685_v55, %v684_v56  ;;  %v2002_v55 = vld [vmem:[%s3038_s1 + $0x160] sm:$0xff]  ;;  %v2004_v56 = vld [vmem:[%s3038_s1 + $0x170] sm:$0xff] }
 0x3bd   :  { %979 = vperm.xlu1 %2575, %v2002_v55   ;;  %989 = vperm.xlu0 %2576, %v2004_v56  }
 0x3be   :  { %2487 = vmatprep.subr.bf16.mxu1 %v2486_v57 }
 0x3bf   :  { %2489 = vmatpush3.bf16.msra.mxu1 %v2486_v57  ;;  %v2003_v57 = vld [vmem:[%s3038_s1 + $0x168] sm:$0xff] }
 0x3c1   :  { %984 = vperm.xlu1 %2575, %v2003_v57  }
 0x3c2   :  { %2294 = vmatmul.mubr.msk.f32.vlgmr.msra.gmra.mrb[8].mxu1 %vm245_vm2, %v1959_v58  ;;  %v2007_v58 = vld [vmem:[%s3038_s1 + $0x188] sm:$0xff] }
 0x3c3   :  { %2296 = vmatprep.mubr.msk.f32.mxu1 %vm245_vm2, %v1960_v59  ;;  %v2005_v59 = vld [vmem:[%s3038_s1 + $0x178] sm:$0xff]  ;;  %1004 = vperm.xlu0 %2576, %v2007_v58  }
 0x3c5   :  { %994 = vperm.xlu1 %2575, %v2005_v59  }
 0x3c6   :  { %2297 = vmatmul.mubr.msk.f32.gmra.mrb[10].mxu1 %vm245_vm2, %v1961_v60  ;;  %v2009_v60 = vld [vmem:[%s3038_s1 + $0x198] sm:$0xff] }
 0x3c7   :  { %2299 = vmatprep.mubr.msk.f32.mxu1 %vm245_vm2, %v1962_v61  ;;  %v2006_v61 = vld [vmem:[%s3038_s1 + $0x180] sm:$0xff]  ;;  %1014 = vperm.xlu0 %2576, %v2009_v60  }
 0x3c9   :  { %999 = vperm.xlu1 %2575, %v2006_v61  }
 0x3ca   :  { %2300 = vmatmul.mubr.msk.f32.gmra.mrb[12].mxu1 %vm245_vm2, %v1963_v62  ;;  %v2008_v62 = vld [vmem:[%s3038_s1 + $0x190] sm:$0xff] }
 0x3cb   :  { %2302 = vmatprep.mubr.msk.f32.mxu1 %vm245_vm2, %v1964_v5  ;;  %2578 = vset.pattern.permute.xlu0 %v2626_v11  ;;  %v478_v5 = vsel %vm88_vm0, %v2769_v2, 0.0 }
 0x3cc   :  { %1162 = vperm.xlu0 %2578, %v2003_v57  }
 0x3cd   :  { %1009 = vperm.xlu1 %2575, %v2008_v62  }
 0x3ce   :  { %2303 = vmatmul.mubr.msk.f32.gmra.mrb[14].mxu1 %vm245_vm2, %v1965_v6  ;;  %v866_v6 = vpop.permute.xlu0 %865 }
 0x3d0   :  { %1174 = vperm.xlu0 %2578, %v2006_v61  }
 0x3d1   :  { %2577 = vset.pattern.permute.xlu1 %v2626_v11 }
 0x3d2   :  { %1158 = vperm.xlu1 %2577, %v2002_v55  }
 0x3d4   :  { %1182 = vperm.xlu0 %2578, %v2008_v62  }
 0x3d6   :  { %1166 = vperm.xlu1 %2577, %v2004_v56  }
 0x3d8   :  { %2579 = vset.pattern.permute.xlu0 %v2630_v3 }
 0x3da   :  { %1170 = vperm.xlu1 %2577, %v2005_v59  }
 0x3de   :  { %1178 = vperm.xlu1 %2577, %v2007_v58  }
 0x3e2   :  { %1186 = vperm.xlu1 %2577, %v2009_v60  }
 0x3e6   :  { %2580 = vset.pattern.permute.xlu1 %v2625_v4 }
 0x495   :  { %v2295_v14 = vpop.f32.mrb[8].mxu1 }
 0x496   :  { %v814_v15 = vadd.f32 %v2295_v14, %v692_v12  ;;  %v808_v16 = vpop.f32.mrb[9].mxu1 }
 0x497   :  { %v809_v17 = vadd.f32 %v808_v16, %v688_v8  ;;  %v479_v8 = vrot.slane %v478_v5, 4 }
 0x498   :  { %v848_v18 = vmul.f32 0.01, %v814_v15 }
 0x499   :  { %v847_v19 = vmul.f32 0.01, %v809_v17  ;;  %v2298_v20 = vpop.f32.mrb[10].mxu1 }
 0x49a   :  { %v856_v21 = vmax.f32 %v814_v15, %v848_v18  ;;  %v824_v22 = vadd.f32 %v2298_v20, %v700_v13  ;;  %v818_v23 = vpop.f32.mrb[11].mxu1  ;;  %v480_v13 = vadd.f32 %v479_v8, %v478_v5 }
 0x49b   :  { %v855_v25 = vmax.f32 %v809_v17, %v847_v19  ;;  %v819_v26 = vadd.f32 %v818_v23, %v696_v9 }
 0x49c   :  { %v850_v28 = vmul.f32 0.01, %v824_v22  ;;  %v481_v14 = vrot.slane %v480_v13, 2 }
 0x49d   :  { %v2491_v29 = vpack.c.bf16 %v856_v21, %v855_v25  ;;  %v849_v30 = vmul.f32 0.01, %v819_v26  ;;  %v2301_v31 = vpop.f32.mrb[12].mxu1 }
 0x49e   :  { %v858_v32 = vmax.f32 %v824_v22, %v850_v28  ;;  %v834_v33 = vadd.f32 %v2301_v31, %v708_v24  ;;  %v828_v34 = vpop.f32.mrb[13].mxu1  ;;  %v482_v16 = vadd.f32 %v481_v14, %v480_v13 }
 0x49f   :  { %v857_v35 = vmax.f32 %v819_v26, %v849_v30  ;;  %v829_v36 = vadd.f32 %v828_v34, %v704_v27  ;;  %2492 = vmatpush3.bf16.msra.mxu0 %v2491_v29 }
 0x4a0   :  { %v852_v37 = vmul.f32 0.01, %v834_v33  ;;  %2493 = vmatprep.subr.bf16.mxu0 %v2627_v63  ;;  %v483_v22 = vrot.slane %v482_v16, 1 }
 0x4a1   :  { %v2494_v39 = vpack.c.bf16 %v858_v32, %v857_v35  ;;  %v851_v40 = vmul.f32 0.01, %v829_v36  ;;  %v2304_v41 = vpop.f32.mrb[14].mxu1  ;;  %v990_v35 = vpop.permute.xlu0 %989 }
 0x4a2   :  { %v860_v43 = vmax.f32 %v834_v33, %v852_v37  ;;  %v844_v44 = vadd.f32 %v2304_v41, %v716_v38  ;;  %v838_v45 = vpop.f32.mrb[15].mxu1  ;;  %v484_v2 = vadd.f32 %v483_v22, %v482_v16  ;;  %v980_v33 = vpop.permute.xlu1 %979  ;;  %v1996_v22 = vld [vmem:[%s3038_s1 + $0x130] sm:$0xff] }
 0x4a3   :  { %v859_v46 = vmax.f32 %v829_v36, %v851_v40  ;;  %v839_v47 = vadd.f32 %v838_v45, %v712_v42  ;;  %2495 = vmatpush3.bf16.msra.mxu0 %v2494_v39 }
 0x4a4   :  { %v854_v48 = vmul.f32 0.01, %v844_v44  ;;  %2496 = vmatprep.subr.bf16.mxu0 %v2627_v63  ;;  %v485_v27 = vsub.f32 0.0, %v484_v2  ;;  %v1998_v2 = vld [vmem:[%s3038_s1 + $0x140] sm:$0xff] }
 0x4a5   :  { %v2497_v49 = vpack.c.bf16 %v860_v43, %v859_v46  ;;  %v853_v50 = vmul.f32 0.01, %v839_v47 }
 0x4a6   :  { %v862_v51 = vmax.f32 %v844_v44, %v854_v48  ;;  %v985_v34 = vpop.permute.xlu1 %984 }
 0x4a7   :  { %v861_v52 = vmax.f32 %v839_v47, %v853_v50  ;;  %2498 = vmatpush3.bf16.msra.mxu0 %v2497_v49  ;;  %v1005_v47 = vpop.permute.xlu0 %1004 }
 0x4a8   :  { %2499 = vmatprep.subr.bf16.mxu0 %v2627_v63 }
 0x4a9   :  { %v2500_v53 = vpack.c.bf16 %v862_v51, %v861_v52 }
 0x4aa   :  { %v995_v37 = vpop.permute.xlu1 %994 }
 0x4ab   :  { %2501 = vmatpush3.bf16.msra.mxu0 %v2500_v53 }
 0x4ae   :  { %2322 = vmatmul.mubr.msk.f32.vlgmr.msra.gmra.mrb[18].mxu0 %vm245_vm2, %v1975_v54  ;;  %v1000_v50 = vpop.permute.xlu1 %999 }
 0x4af   :  { %2326 = vmatprep.mubr.msk.f32.mxu0 %vm71_vm1, %v2002_v55 }
 0x581   :  { %v937_v7 = vpop.f32.mrb[18].mxu0 }
 0x582   :  { %v938_v9 = vadd.f32 %v937_v7, %v866_v6  ;;  %v2323_v12 = vpop.f32.mrb[19].mxu0  ;;  %v1010_v7 = vpop.permute.xlu1 %1009 }
 0x584   :  { %2589 = vtanh.f32 %v938_v9  ;;  %v943_v25 = vrot.slane %v938_v9, 2 }
 0x586   :  { %v945_v29 = vsub.f32 %v2650_v0, %v943_v25  ;;  %v1994_v0 = vld [vmem:[%s3038_s1 + $0x120] sm:$0xff]  ;;  %v2000_v25 = vld [vmem:[%s3038_s1 + $0x150] sm:$0xff] }
 0x587   :  { %2354 = vmatprep.mubr.msk.f32.mxu1 %vm245_vm2, %v1994_v0 }
 0x58e   :  { %v2590_v15 = vpop.eup %2589 }
 0x58f   :  { %v946_v17 = vsub.f32 0.0, %v2590_v15  ;;  %v950_v18 = vsel %vm88_vm0, %v2590_v15, 0.0 }
 0x590   :  { %v951_v19 = vrot.slane %v950_v18, 4 }
 0x591   :  { %v947_v20 = vmul.f32 1.442695, %v946_v17 }
 0x592   :  { %v952_v21 = vadd.f32 %v951_v19, %v950_v18 }
 0x593   :  { %2591 = vpow2.f32 %v947_v20 }
 0x594   :  { %v953_v23 = vrot.slane %v952_v21, 2 }
 0x596   :  { %v954_v24 = vadd.f32 %v953_v23, %v952_v21  ;;  %v1995_v21 = vld [vmem:[%s3038_s1 + $0x128] sm:$0xff]  ;;  %v1997_v23 = vld [vmem:[%s3038_s1 + $0x138] sm:$0xff] }
 0x598   :  { %v955_v26 = vrot.slane %v954_v24, 1 }
 0x59a   :  { %v956_v28 = vadd.f32 %v955_v26, %v954_v24  ;;  %v1999_v24 = vld [vmem:[%s3038_s1 + $0x148] sm:$0xff]  ;;  %v2001_v26 = vld [vmem:[%s3038_s1 + $0x158] sm:$0xff] }
 0x59c   :  { %v2864_v30 = vsub.f32 %v485_v27, %v956_v28  ;;  %v2010_v27 = vld [vmem:[%s3038_s1 + $0x160] sm:$0xf]  ;;  %v1159_v28 = vpop.permute.xlu1 %1158 }
 0x59d   :  { %v2592_v31 = vpop.eup %2591  ;;  %1336 = vperm.xlu0 %2579, %v2010_v27  }
 0x59e   :  { %v2866_v32 = vmul.f32 %v2592_v31, %v945_v29 }
 0x5a0   :  { %2324 = vmatprep.subr.msk.mxu0 %vm88_vm0, %v2866_v32  ;;  %v1167_v29 = vpop.permute.xlu1 %1166 }
 0x5a1   :  { %2325 = vmatpush3.msk.msra.mxu0 %vm88_vm0, %v2866_v32  ;;  %2581 = vset.pattern.permute.xlu0 %v2625_v4 }
 0x5a2   :  { %2327 = vmatmul.mubr.msk.f32.vlgmr.msra.gmra.mrb[20].mxu0 %vm71_vm1, %v2003_v57  ;;  %2518 = vmatprep.subr.bf16.mxu0 %v2627_v63 }
 0x5a3   :  { %2329 = vmatprep.mubr.msk.f32.mxu0 %vm71_vm1, %v2004_v56 }
 0x5a4   :  { %v1171_v0 = vpop.permute.xlu1 %1170 }
 0x5a6   :  { %2330 = vmatmul.mubr.msk.f32.gmra.mrb[22].mxu0 %vm71_vm1, %v2005_v59 }
 0x5a7   :  { %2332 = vmatprep.mubr.msk.f32.mxu0 %vm71_vm1, %v2006_v61  ;;  %v1015_v61 = vpop.permute.xlu0 %1014 }
 0x5aa   :  { %2333 = vmatmul.mubr.msk.f32.gmra.mrb[24].mxu0 %vm71_vm1, %v2007_v58 }
 0x5ab   :  { %2335 = vmatprep.mubr.msk.f32.mxu0 %vm71_vm1, %v2008_v62  ;;  %v1163_v31 = vpop.permute.xlu0 %1162 }
 0x5ae   :  { %2336 = vmatmul.mubr.msk.f32.gmra.mrb[26].mxu0 %vm71_vm1, %v2009_v60 }
 0x5af   :  { %2382 = vmatprep.mubr.msk.f32.mxu0 %vm2628_vm3, %v2629_v1 }
 0x675   :  { %v2328_v36 = vpop.f32.mrb[20].mxu0 }
 0x676   :  { %v1108_v38 = vadd.f32 %v2328_v36, %v985_v34  ;;  %v1102_v39 = vpop.f32.mrb[21].mxu0 }
 0x677   :  { %v1103_v40 = vadd.f32 %v1102_v39, %v980_v33 }
 0x678   :  { %v1142_v41 = vmul.f32 0.01, %v1108_v38 }
 0x679   :  { %v1141_v42 = vmul.f32 0.01, %v1103_v40  ;;  %v2331_v43 = vpop.f32.mrb[22].mxu0 }
 0x67a   :  { %v1150_v44 = vmax.f32 %v1108_v38, %v1142_v41  ;;  %v1118_v45 = vadd.f32 %v2331_v43, %v995_v37  ;;  %v1112_v46 = vpop.f32.mrb[23].mxu0  ;;  %v1179_v43 = vpop.permute.xlu1 %1178 }
 0x67b   :  { %v1149_v48 = vmax.f32 %v1103_v40, %v1141_v42  ;;  %v1113_v49 = vadd.f32 %v1112_v46, %v990_v35  ;;  %v1175_v46 = vpop.permute.xlu0 %1174 }
 0x67c   :  { %v1144_v51 = vmul.f32 0.01, %v1118_v45 }
 0x67d   :  { %v1143_v52 = vmul.f32 0.01, %v1113_v49  ;;  %v2334_v53 = vpop.f32.mrb[24].mxu0  ;;  %v2502_v54 = vpack.c.bf16 %v1150_v44, %v1149_v48 }
 0x67e   :  { %v1152_v55 = vmax.f32 %v1118_v45, %v1144_v51  ;;  %v1128_v56 = vadd.f32 %v2334_v53, %v1005_v47  ;;  %v1122_v57 = vpop.f32.mrb[25].mxu0 }
 0x67f   :  { %v1151_v58 = vmax.f32 %v1113_v49, %v1143_v52  ;;  %v1123_v59 = vadd.f32 %v1122_v57, %v1000_v50  ;;  %2503 = vmatprep.subr.bf16.mxu1 %v2502_v54 }
 0x680   :  { %v1146_v60 = vmul.f32 0.01, %v1128_v56  ;;  %2505 = vmatpush3.bf16.msra.mxu1 %v2502_v54 }
 0x681   :  { %v1145_v62 = vmul.f32 0.01, %v1123_v59  ;;  %v2337_v5 = vpop.f32.mrb[26].mxu0  ;;  %v2506_v6 = vpack.c.bf16 %v1152_v55, %v1151_v58 }
 0x682   :  { %v1154_v8 = vmax.f32 %v1128_v56, %v1146_v60  ;;  %v1138_v9 = vadd.f32 %v2337_v5, %v1015_v61  ;;  %v1132_v12 = vpop.f32.mrb[27].mxu0  ;;  %v1187_v56 = vpop.permute.xlu1 %1186 }
 0x683   :  { %v1153_v13 = vmax.f32 %v1123_v59, %v1145_v62  ;;  %v1133_v14 = vadd.f32 %v1132_v12, %v1010_v7  ;;  %2507 = vmatprep.subr.bf16.mxu1 %v2506_v6  ;;  %v1183_v60 = vpop.permute.xlu0 %1182 }
 0x684   :  { %v1148_v15 = vmul.f32 0.01, %v1138_v9  ;;  %2509 = vmatpush3.bf16.msra.mxu1 %v2506_v6 }
 0x685   :  { %v1147_v16 = vmul.f32 0.01, %v1133_v14  ;;  %v2510_v17 = vpack.c.bf16 %v1154_v8, %v1153_v13 }
 0x686   :  { %v1156_v18 = vmax.f32 %v1138_v9, %v1148_v15 }
 0x687   :  { %v1155_v19 = vmax.f32 %v1133_v14, %v1147_v16  ;;  %2511 = vmatprep.subr.bf16.mxu1 %v2510_v17  ;;  %v2011_v16 = vld [vmem:[%s3038_s1 + $0x1a0] sm:$0xf] }
 0x688   :  { %2513 = vmatpush3.bf16.msra.mxu1 %v2510_v17  ;;  %v2038_v17 = vld [vmem:[%s3038_s1 + $0x1f0] sm:$0xff] }
 0x689   :  { %v2514_v20 = vpack.c.bf16 %v1156_v18, %v1155_v19  ;;  %1450 = vperm.xlu1 %2580, %v2038_v17   ;;  %v2039_v18 = vld [vmem:[%s3038_s1 + $0x1f8] sm:$0xff]  ;;  %v2040_v19 = vld [vmem:[%s3038_s1 + $0x200] sm:$0xff] }
 0x68a   :  { %1460 = vperm.xlu0 %2581, %v2040_v19  }
 0x68b   :  { %2515 = vmatprep.subr.bf16.mxu1 %v2514_v20 }
 0x68c   :  { %2517 = vmatpush3.bf16.msra.mxu1 %v2514_v20  ;;  %v2041_v20 = vld [vmem:[%s3038_s1 + $0x208] sm:$0xff] }
 0x68d   :  { %1455 = vperm.xlu1 %2580, %v2039_v18  }
 0x68f   :  { %2355 = vmatmul.mubr.msk.f32.vlgmr.msra.gmra.mrb[16].mxu1 %vm245_vm2, %v1995_v21  ;;  %v2043_v21 = vld [vmem:[%s3038_s1 + $0x218] sm:$0xff] }
 0x690   :  { %2357 = vmatprep.mubr.msk.f32.mxu1 %vm245_vm2, %v1996_v22  ;;  %1475 = vperm.xlu0 %2581, %v2043_v21   ;;  %v2042_v22 = vld [vmem:[%s3038_s1 + $0x210] sm:$0xff] }
 0x691   :  { %1465 = vperm.xlu1 %2580, %v2041_v20  }
 0x693   :  { %2358 = vmatmul.mubr.msk.f32.gmra.mrb[18].mxu1 %vm245_vm2, %v1997_v23  ;;  %v2045_v23 = vld [vmem:[%s3038_s1 + $0x228] sm:$0xff] }
 0x694   :  { %2360 = vmatprep.mubr.msk.f32.mxu1 %vm245_vm2, %v1998_v2  ;;  %1485 = vperm.xlu0 %2581, %v2045_v23   ;;  %v2044_v2 = vld [vmem:[%s3038_s1 + $0x220] sm:$0xff] }
 0x695   :  { %1470 = vperm.xlu1 %2580, %v2042_v22  }
 0x697   :  { %2361 = vmatmul.mubr.msk.f32.gmra.mrb[20].mxu1 %vm245_vm2, %v1999_v24  ;;  %v1337_v24 = vpop.permute.xlu0 %1336 }
 0x698   :  { %2363 = vmatprep.mubr.msk.f32.mxu1 %vm245_vm2, %v2000_v25  ;;  %2583 = vset.pattern.permute.xlu0 %v2626_v11 }
 0x699   :  { %1480 = vperm.xlu1 %2580, %v2044_v2   ;;  %1634 = vperm.xlu0 %2583, %v2039_v18  }
 0x69b   :  { %2364 = vmatmul.mubr.msk.f32.gmra.mrb[22].mxu1 %vm245_vm2, %v2001_v26 }
 0x69d   :  { %2582 = vset.pattern.permute.xlu1 %v2626_v11  ;;  %1646 = vperm.xlu0 %2583, %v2042_v22  }
 0x69e   :  { %1630 = vperm.xlu1 %2582, %v2038_v17  }
 0x6a1   :  { %1654 = vperm.xlu0 %2583, %v2044_v2  }
 0x6a2   :  { %1638 = vperm.xlu1 %2582, %v2040_v19  }
 0x6a5   :  { %2584 = vset.pattern.permute.xlu0 %v2630_v3 }
 0x6a6   :  { %1642 = vperm.xlu1 %2582, %v2041_v20  }
 0x6aa   :  { %1650 = vperm.xlu1 %2582, %v2043_v21  }
 0x6ae   :  { %1658 = vperm.xlu1 %2582, %v2045_v23  }
 0x762   :  { %v2356_v33 = vpop.f32.mrb[16].mxu1 }
 0x763   :  { %v1285_v34 = vadd.f32 %v2356_v33, %v1163_v31  ;;  %v1279_v35 = vpop.f32.mrb[17].mxu1 }
 0x764   :  { %v1280_v36 = vadd.f32 %v1279_v35, %v1159_v28 }
 0x765   :  { %v1319_v37 = vmul.f32 0.01, %v1285_v34 }
 0x766   :  { %v1318_v38 = vmul.f32 0.01, %v1280_v36  ;;  %v2359_v39 = vpop.f32.mrb[18].mxu1 }
 0x767   :  { %v1327_v40 = vmax.f32 %v1285_v34, %v1319_v37  ;;  %v1295_v41 = vadd.f32 %v2359_v39, %v1171_v0  ;;  %v1289_v42 = vpop.f32.mrb[19].mxu1 }
 0x768   :  { %v1326_v44 = vmax.f32 %v1280_v36, %v1318_v38  ;;  %v1290_v45 = vadd.f32 %v1289_v42, %v1167_v29 }
 0x769   :  { %v1321_v47 = vmul.f32 0.01, %v1295_v41 }
 0x76a   :  { %v2519_v4 = vpack.c.bf16 %v1327_v40, %v1326_v44  ;;  %v1320_v48 = vmul.f32 0.01, %v1290_v45  ;;  %v2362_v49 = vpop.f32.mrb[20].mxu1 }
 0x76b   :  { %v1329_v50 = vmax.f32 %v1295_v41, %v1321_v47  ;;  %v1305_v51 = vadd.f32 %v2362_v49, %v1179_v43  ;;  %v1299_v52 = vpop.f32.mrb[21].mxu1  ;;  %v1451_v43 = vpop.permute.xlu1 %1450 }
 0x76c   :  { %v1328_v53 = vmax.f32 %v1290_v45, %v1320_v48  ;;  %v1300_v54 = vadd.f32 %v1299_v52, %v1175_v46  ;;  %2520 = vmatpush3.bf16.msra.mxu0 %v2519_v4  ;;  %v1461_v45 = vpop.permute.xlu0 %1460 }
 0x76d   :  { %v1323_v55 = vmul.f32 0.01, %v1305_v51  ;;  %2521 = vmatprep.subr.bf16.mxu0 %v2627_v63 }
 0x76e   :  { %v2522_v57 = vpack.c.bf16 %v1329_v50, %v1328_v53  ;;  %v1322_v58 = vmul.f32 0.01, %v1300_v54  ;;  %v2365_v59 = vpop.f32.mrb[22].mxu1 }
 0x76f   :  { %v1331_v61 = vmax.f32 %v1305_v51, %v1323_v55  ;;  %v1315_v62 = vadd.f32 %v2365_v59, %v1187_v56  ;;  %v1309_v5 = vpop.f32.mrb[23].mxu1  ;;  %v1456_v44 = vpop.permute.xlu1 %1455 }
 0x770   :  { %v1330_v6 = vmax.f32 %v1300_v54, %v1322_v58  ;;  %v1310_v7 = vadd.f32 %v1309_v5, %v1183_v60  ;;  %2523 = vmatpush3.bf16.msra.mxu0 %v2522_v57  ;;  %v1476_v56 = vpop.permute.xlu0 %1475 }
 0x771   :  { %v1325_v8 = vmul.f32 0.01, %v1315_v62  ;;  %2524 = vmatprep.subr.bf16.mxu0 %v2627_v63 }
 0x772   :  { %v2525_v9 = vpack.c.bf16 %v1331_v61, %v1330_v6  ;;  %v1324_v12 = vmul.f32 0.01, %v1310_v7 }
 0x773   :  { %v1333_v13 = vmax.f32 %v1315_v62, %v1325_v8  ;;  %v1466_v47 = vpop.permute.xlu1 %1465 }
 0x774   :  { %v1332_v14 = vmax.f32 %v1310_v7, %v1324_v12  ;;  %2526 = vmatpush3.bf16.msra.mxu0 %v2525_v9 }
 0x775   :  { %2527 = vmatprep.subr.bf16.mxu0 %v2627_v63 }
 0x776   :  { %v2528_v15 = vpack.c.bf16 %v1333_v13, %v1332_v14  ;;  %v1486_v13 = vpop.permute.xlu0 %1485 }
 0x777   :  { %v1471_v58 = vpop.permute.xlu1 %1470 }
 0x778   :  { %2529 = vmatpush3.bf16.msra.mxu0 %v2528_v15 }
 0x77b   :  { %2383 = vmatmul.mubr.msk.f32.vlgmr.msra.gmra.mrb[28].mxu0 %vm245_vm2, %v2011_v16 }
 0x77c   :  { %2387 = vmatprep.mubr.msk.f32.mxu0 %vm71_vm1, %v2038_v17  ;;  %v1481_v17 = vpop.permute.xlu1 %1480 }
 0x84e   :  { %v1408_v25 = vpop.f32.mrb[28].mxu0 }
 0x84f   :  { %v1409_v26 = vadd.f32 %v1408_v25, %v1337_v24  ;;  %v2384_v27 = vpop.f32.mrb[29].mxu0 }
 0x851   :  { %2593 = vtanh.f32 %v1409_v26  ;;  %v1413_v39 = vsub.f32 %v2773_v10, %v1409_v26  ;;  %v2030_v10 = vld [vmem:[%s3038_s1 + $0x1b0] sm:$0xff] }
 0x852   :  { %2415 = vmatprep.mubr.msk.f32.mxu1 %vm245_vm2, %v2030_v10 }
 0x85b   :  { %v2594_v28 = vpop.eup %2593 }
 0x85c   :  { %v1414_v29 = vsub.f32 0.0, %v2594_v28  ;;  %v1421_v31 = vsel %vm88_vm0, %v2594_v28, 0.0  ;;  %v2031_v28 = vld [vmem:[%s3038_s1 + $0x1b8] sm:$0xff] }
 0x85d   :  { %v1422_v0 = vrot.slane %v1421_v31, 4 }
 0x85e   :  { %v1415_v11 = vmul.f32 1.442695, %v1414_v29  ;;  %v2032_v29 = vld [vmem:[%s3038_s1 + $0x1c0] sm:$0xff] }
 0x85f   :  { %v1423_v33 = vadd.f32 %v1422_v0, %v1421_v31  ;;  %v2033_v31 = vld [vmem:[%s3038_s1 + $0x1c8] sm:$0xff]  ;;  %v2034_v0 = vld [vmem:[%s3038_s1 + $0x1d0] sm:$0xff] }
 0x860   :  { %2595 = vpow2.f32 %v1415_v11  ;;  %v2035_v11 = vld [vmem:[%s3038_s1 + $0x1d8] sm:$0xff] }
 0x861   :  { %v1424_v34 = vrot.slane %v1423_v33, 2 }
 0x863   :  { %v1425_v35 = vadd.f32 %v1424_v34, %v1423_v33  ;;  %v2036_v33 = vld [vmem:[%s3038_s1 + $0x1e0] sm:$0xff]  ;;  %v2037_v34 = vld [vmem:[%s3038_s1 + $0x1e8] sm:$0xff] }
 0x865   :  { %v1426_v36 = vrot.slane %v1425_v35, 1 }
 0x867   :  { %v2954_v37 = vadd.f32 %v1426_v36, %v1425_v35  ;;  %v2046_v35 = vld [vmem:[%s3038_s1 + $0x1f0] sm:$0xf]  ;;  %v1631_v36 = vpop.permute.xlu1 %1630 }
 0x868   :  { %1808 = vperm.xlu0 %2584, %v2046_v35  }
 0x869   :  { %v1428_v3 = vsub.f32 %v2864_v30, %v2954_v37 }
 0x86a   :  { %v2596_v38 = vpop.eup %2595 }
 0x86b   :  { %v1418_v40 = vrot.slane %v2596_v38, 6  ;;  %v1639_v38 = vpop.permute.xlu1 %1638 }
 0x86d   :  { %v2959_v41 = vmul.f32 %v1418_v40, %v1413_v39  ;;  %v1635_v39 = vpop.permute.xlu0 %1634 }
 0x86f   :  { %v1489_v42 = vrot.slane %v2959_v41, 2  ;;  %v1643_v40 = vpop.permute.xlu1 %1642 }
 0x871   :  { %2385 = vmatprep.subr.msk.mxu0 %vm88_vm0, %v1489_v42 }
 0x872   :  { %2386 = vmatpush3.msk.msra.mxu0 %vm88_vm0, %v1489_v42 }
 0x873   :  { %2388 = vmatmul.mubr.msk.f32.vlgmr.msra.gmra.mrb[30].mxu0 %vm71_vm1, %v2039_v18  ;;  %2546 = vmatprep.subr.bf16.mxu0 %v2627_v63 }
 0x874   :  { %2390 = vmatprep.mubr.msk.f32.mxu0 %vm71_vm1, %v2040_v19 }
 0x877   :  { %2391 = vmatmul.mubr.msk.f32.gmra.mrb[32].mxu0 %vm71_vm1, %v2041_v20 }
 0x878   :  { %2393 = vmatprep.mubr.msk.f32.mxu0 %vm71_vm1, %v2042_v22 }
 0x87b   :  { %2394 = vmatmul.mubr.msk.f32.gmra.mrb[34].mxu0 %vm71_vm1, %v2043_v21 }
 0x87c   :  { %2396 = vmatprep.mubr.msk.f32.mxu0 %vm71_vm1, %v2044_v2 }
 0x87f   :  { %2397 = vmatmul.mubr.msk.f32.gmra.mrb[36].mxu0 %vm71_vm1, %v2045_v23 }
 0x880   :  { %2443 = vmatprep.mubr.msk.f32.mxu0 %vm2628_vm3, %v2629_v1 }
 0x946   :  { %v2389_v46 = vpop.f32.mrb[30].mxu0 }
 0x947   :  { %v1580_v4 = vadd.f32 %v2389_v46, %v1456_v44  ;;  %v1574_v48 = vpop.f32.mrb[31].mxu0 }
 0x948   :  { %v1575_v49 = vadd.f32 %v1574_v48, %v1451_v43 }
 0x949   :  { %v1614_v50 = vmul.f32 0.01, %v1580_v4 }
 0x94a   :  { %v1613_v51 = vmul.f32 0.01, %v1575_v49  ;;  %v2392_v52 = vpop.f32.mrb[32].mxu0 }
 0x94b   :  { %v1622_v53 = vmax.f32 %v1580_v4, %v1614_v50  ;;  %v1590_v54 = vadd.f32 %v2392_v52, %v1466_v47  ;;  %v1584_v1 = vpop.f32.mrb[33].mxu0  ;;  %v1651_v50 = vpop.permute.xlu1 %1650 }
 0x94c   :  { %v1621_v55 = vmax.f32 %v1575_v49, %v1613_v51  ;;  %v1585_v57 = vadd.f32 %v1584_v1, %v1461_v45 }
 0x94d   :  { %v1616_v59 = vmul.f32 0.01, %v1590_v54 }
 0x94e   :  { %v1615_v60 = vmul.f32 0.01, %v1585_v57  ;;  %v2395_v61 = vpop.f32.mrb[34].mxu0  ;;  %v2530_v62 = vpack.c.bf16 %v1622_v53, %v1621_v55  ;;  %v1647_v53 = vpop.permute.xlu0 %1646 }
 0x94f   :  { %v1624_v5 = vmax.f32 %v1590_v54, %v1616_v59  ;;  %v1600_v6 = vadd.f32 %v2395_v61, %v1476_v56  ;;  %v1594_v7 = vpop.f32.mrb[35].mxu0 }
 0x950   :  { %v1623_v8 = vmax.f32 %v1585_v57, %v1615_v60  ;;  %v1595_v9 = vadd.f32 %v1594_v7, %v1471_v58  ;;  %2531 = vmatprep.subr.bf16.mxu1 %v2530_v62 }
 0x951   :  { %v1618_v12 = vmul.f32 0.01, %v1600_v6  ;;  %2533 = vmatpush3.bf16.msra.mxu1 %v2530_v62 }
 0x952   :  { %v1617_v14 = vmul.f32 0.01, %v1595_v9  ;;  %v2398_v15 = vpop.f32.mrb[36].mxu0  ;;  %v2534_v16 = vpack.c.bf16 %v1624_v5, %v1623_v8  ;;  %v1659_v5 = vpop.permute.xlu1 %1658 }
 0x953   :  { %v1626_v18 = vmax.f32 %v1600_v6, %v1618_v12  ;;  %v1610_v19 = vadd.f32 %v2398_v15, %v1486_v13  ;;  %v1604_v20 = vpop.f32.mrb[37].mxu0 }
 0x954   :  { %v1625_v21 = vmax.f32 %v1595_v9, %v1617_v14  ;;  %v1605_v22 = vadd.f32 %v1604_v20, %v1481_v17  ;;  %2535 = vmatprep.subr.bf16.mxu1 %v2534_v16  ;;  %v1655_v9 = vpop.permute.xlu0 %1654 }
 0x955   :  { %v1620_v23 = vmul.f32 0.01, %v1610_v19  ;;  %2537 = vmatpush3.bf16.msra.mxu1 %v2534_v16 }
 0x956   :  { %v1619_v2 = vmul.f32 0.01, %v1605_v22  ;;  %v2538_v24 = vpack.c.bf16 %v1626_v18, %v1625_v21 }
 0x957   :  { %v1628_v25 = vmax.f32 %v1610_v19, %v1620_v23  ;;  %v2047_v23 = vld [vmem:[%s3038_s1 + $0x230] sm:$0xf]  ;;  %s2631_s1 = smov [#allocation2]  }
 0x958   :  { %v1627_v26 = vmax.f32 %v1605_v22, %v1619_v2  ;;  %2539 = vmatprep.subr.bf16.mxu1 %v2538_v24  ;;  %v1809_v2 = vpop.permute.xlu0 %1808  ;;  %s1932_s10 = sshll.u32 %s2631_s1, 4  ;;  %s1933_s10 = int_to_ptr.vmem [resolvable:$true] %s1932_s10 }
 0x959   :  { %2541 = vmatpush3.bf16.msra.mxu1 %v2538_v24  ;;  %s2601_s11 = scalar_lea.vmem %s1933_s10, 16  ;;  %s2605_s12 = scalar_lea.vmem %s1933_s10, 32 }
 0x95a   :  { %v2542_v27 = vpack.c.bf16 %v1628_v25, %v1627_v26  ;;  %p2602_p0 = scmp.ne.s32.totalorder %s1933_s10, %s2601_s11  ;;  %p2606_p1 = scmp.lt.s32.totalorder %s1933_s10, %s1933_s10 }
 0x95b   :  { %p2607_p2 = scmp.lt.s32.totalorder %s2605_s12, %s2601_s11 }
 0x95c   :  { %2543 = vmatprep.subr.bf16.mxu1 %v2542_v27 }
 0x95d   :  { %2545 = vmatpush3.bf16.msra.mxu1 %v2542_v27  ;;  %p2608_p3 = por %p2607_p2, %p2606_p1 }
 0x95f   :  { %p2609_p4 = pnand %p2608_p3, %p2602_p0 }
 0x960   :  { %2416 = vmatmul.mubr.msk.f32.vlgmr.msra.gmra.mrb[24].mxu1 %vm245_vm2, %v2031_v28  ;;  %v1909_v28 = vmul.f32 %v2959_v41, %v2959_v41 }
 0x961   :  { %2418 = vmatprep.mubr.msk.f32.mxu1 %vm245_vm2, %v2032_v29 }
 0x964   :  { %2419 = vmatmul.mubr.msk.f32.gmra.mrb[26].mxu1 %vm245_vm2, %v2033_v31 }
 0x965   :  { %2421 = vmatprep.mubr.msk.f32.mxu1 %vm245_vm2, %v2034_v0 }
 0x968   :  { %2422 = vmatmul.mubr.msk.f32.gmra.mrb[28].mxu1 %vm245_vm2, %v2035_v11  ;;  %v1911_v11 = vrot.slane %v1909_v28, 2 }
 0x969   :  { %2424 = vmatprep.mubr.msk.f32.mxu1 %vm245_vm2, %v2036_v33 }
 0x96a   :  { %v1913_v35 = vsel %vm88_vm0, %v1911_v11, 0.0 }
 0x96c   :  { %2425 = vmatmul.mubr.msk.f32.gmra.mrb[30].mxu1 %vm245_vm2, %v2037_v34 }
 0xa33   :  { %v2417_v42 = vpop.f32.mrb[24].mxu1 }
 0xa34   :  { %v1757_v10 = vadd.f32 %v2417_v42, %v1635_v39  ;;  %v1751_v43 = vpop.f32.mrb[25].mxu1 }
 0xa35   :  { %v1752_v44 = vadd.f32 %v1751_v43, %v1631_v36 }
 0xa36   :  { %v1791_v45 = vmul.f32 0.01, %v1757_v10 }
 0xa37   :  { %v1790_v46 = vmul.f32 0.01, %v1752_v44  ;;  %v2420_v47 = vpop.f32.mrb[26].mxu1 }
 0xa38   :  { %v1799_v4 = vmax.f32 %v1757_v10, %v1791_v45  ;;  %v1767_v48 = vadd.f32 %v2420_v47, %v1643_v40  ;;  %v1761_v49 = vpop.f32.mrb[27].mxu1  ;;  %v1914_v40 = vrot.slane %v1913_v35, 4 }
 0xa39   :  { %v1798_v51 = vmax.f32 %v1752_v44, %v1790_v46  ;;  %v1762_v52 = vadd.f32 %v1761_v49, %v1639_v38 }
 0xa3a   :  { %v1793_v54 = vmul.f32 0.01, %v1767_v48  ;;  %v1915_v44 = vadd.f32 %v1914_v40, %v1913_v35 }
 0xa3b   :  { %v2547_v1 = vpack.c.bf16 %v1799_v4, %v1798_v51  ;;  %v1792_v55 = vmul.f32 0.01, %v1762_v52  ;;  %v2423_v56 = vpop.f32.mrb[28].mxu1 }
 0xa3c   :  { %v1801_v57 = vmax.f32 %v1767_v48, %v1793_v54  ;;  %v1777_v58 = vadd.f32 %v2423_v56, %v1651_v50  ;;  %v1771_v59 = vpop.f32.mrb[29].mxu1  ;;  %v1916_v47 = vrot.slane %v1915_v44, 2 }
 0xa3d   :  { %v1800_v60 = vmax.f32 %v1762_v52, %v1792_v55  ;;  %v1772_v61 = vadd.f32 %v1771_v59, %v1647_v53  ;;  %2548 = vmatpush3.bf16.msra.mxu0 %v2547_v1 }
 0xa3e   :  { %v1795_v62 = vmul.f32 0.01, %v1777_v58  ;;  %2549 = vmatprep.subr.bf16.mxu0 %v2627_v63  ;;  %v1917_v50 = vadd.f32 %v1916_v47, %v1915_v44 }
 0xa3f   :  { %v2550_v6 = vpack.c.bf16 %v1801_v57, %v1800_v60  ;;  %v1794_v7 = vmul.f32 0.01, %v1772_v61  ;;  %v2426_v8 = vpop.f32.mrb[30].mxu1 }
 0xa40   :  { %v1803_v12 = vmax.f32 %v1777_v58, %v1795_v62  ;;  %v1787_v13 = vadd.f32 %v2426_v8, %v1659_v5  ;;  %v1781_v14 = vpop.f32.mrb[31].mxu1  ;;  %v1918_v53 = vrot.slane %v1917_v50, 1 }
 0xa41   :  { %v1802_v15 = vmax.f32 %v1772_v61, %v1794_v7  ;;  %v1782_v16 = vadd.f32 %v1781_v14, %v1655_v9  ;;  %2551 = vmatpush3.bf16.msra.mxu0 %v2550_v6 }
 0xa42   :  { %v1797_v17 = vmul.f32 0.01, %v1787_v13  ;;  %2552 = vmatprep.subr.bf16.mxu0 %v2627_v63 }
 0xa43   :  { %v2553_v18 = vpack.c.bf16 %v1803_v12, %v1802_v15  ;;  %v1796_v19 = vmul.f32 0.01, %v1782_v16 }
 0xa44   :  { %v1805_v20 = vmax.f32 %v1787_v13, %v1797_v17 }
 0xa45   :  { %v1804_v21 = vmax.f32 %v1782_v16, %v1796_v19  ;;  %2554 = vmatpush3.bf16.msra.mxu0 %v2553_v18 }
 0xa46   :  { %2555 = vmatprep.subr.bf16.mxu0 %v2627_v63 }
 0xa47   :  { %v2556_v22 = vpack.c.bf16 %v1805_v20, %v1804_v21 }
 0xa49   :  { %2557 = vmatpush3.bf16.msra.mxu0 %v2556_v22 }
 0xa4c   :  { %2444 = vmatmul.mubr.msk.f32.vlgmr.msra.gmra.mrb[38].mxu0 %vm245_vm2, %v2047_v23 }
 0xb1f   :  { %v1880_v24 = vpop.f32.mrb[38].mxu0 }
 0xb20   :  { %v1881_v25 = vadd.f32 %v1880_v24, %v1809_v2  ;;  %v2445_v26 = vpop.f32.mrb[39].mxu0 }
 0xb22   :  { %2597 = vtanh.f32 %v1881_v25  ;;  %v1886_v38 = vrot.slane %v1881_v25, 2 }
 0xb24   :  { %v1888_v10 = vsub.f32 %v2866_v32, %v1886_v38  ;;  %v1919_v32 = vadd.f32 %v1918_v53, %v1917_v50 }
 0xb2c   :  { %v2598_v27 = vpop.eup %2597 }
 0xb2d   :  { %v1889_v29 = vsub.f32 0.0, %v2598_v27  ;;  %v1893_v63 = vsel %vm88_vm0, %v2598_v27, 0.0 }
 0xb2e   :  { %v1894_v31 = vrot.slane %v1893_v63, 4 }
 0xb2f   :  { %v1890_v0 = vmul.f32 1.442695, %v1889_v29 }
 0xb30   :  { %v1895_v33 = vadd.f32 %v1894_v31, %v1893_v63 }
 0xb31   :  { %2599 = vpow2.f32 %v1890_v0 }
 0xb32   :  { %v1896_v34 = vrot.slane %v1895_v33, 2 }
 0xb34   :  { %v1897_v36 = vadd.f32 %v1896_v34, %v1895_v33 }
 0xb36   :  { %v1898_v39 = vrot.slane %v1897_v36, 1 }
 0xb38   :  { %v1899_v42 = vadd.f32 %v1898_v39, %v1897_v36 }
 0xb3a   :  { %v1900_v41 = vsub.f32 %v1428_v3, %v1899_v42 }
 0xb3b   :  { %v2600_v43 = vpop.eup %2599 }
 0xb3c   :  { %v1892_v45 = vmul.f32 %v2600_v43, %v1888_v10 }
 0xb3e   :  { %v1901_v46 = vmul.f32 %v1892_v45, %v1892_v45 }
 0xb40   :  { %v1902_v4 = vsel %vm88_vm0, %v1901_v46, 0.0 }
 0xb41   :  { %v1903_v48 = vrot.slane %v1902_v4, 4 }
 0xb43   :  { %v1904_v49 = vadd.f32 %v1903_v48, %v1902_v4 }
 0xb45   :  { %v1905_v51 = vrot.slane %v1904_v49, 2 }
 0xb47   :  { %v1906_v52 = vadd.f32 %v1905_v51, %v1904_v49 }
 0xb49   :  { %v1907_v54 = vrot.slane %v1906_v52, 1 }
 0xb4b   :  { %v1908_v1 = vadd.f32 %v1907_v54, %v1906_v52 }
 0xb4d   :  { %v1920_v55 = vadd.f32 %v1919_v32, %v1908_v1 }
 0xb4f   :  { %v1921_v56 = vmul.f32 -0.5, %v1920_v55 }
 0xb51   :  { %v1922_v30 = vadd.f32 -3.675754, %v1921_v56 }
 0xb53   :  { %v1923_v37 = vadd.f32 %v1922_v30, %v1900_v41 }
 0xb55   :  { %v1924_v3 = vsub.f32 0.0, %v1923_v37 }
 0xb57   :  { %1925 = vst [vmem:[#allocation2] sm:$0x1] %v1924_v3 }
 0xb58   :  { %2612 = shalt.err (!%p2609_p4)
}
 0xb59   :  { %s2613_s15 = scalar_lea.hbm %s3039_s2, 16 }
 0xb5a   :  { %p2614_p5 = scmp.ne.s32.totalorder %s3039_s2, %s2613_s15  ;;  %p2617_p6 = scmp.lt.u32.totalorder %s2613_s15, %s3039_s2 }
 0xb5c   :  { %p2619_p7 = pnand %p2617_p6, %p2614_p5 }
 0xb5e   :  { %2622 = shalt.err (!%p2619_p7)
}
 0xb5f   :  { %1935 = dma.vmem_to_hbm [thread:$0]  %s1933_s10, 16, %s3039_s2, [#allocation3]  }
 0xb60   :  { %2623 = dma.done.wait [#allocation3], 16  }
 0xb61   :  { %2624 = vsyncadd [#allocation3], 4294967280 }
 0xb62   :  { %1939 = vsyncpa [#allocation3], 1 }

</bundles_post_ra>
